<compile_context>
chip_gen: v7x
topology: tpu7x:2x2x1
jax: 0.10.0
libtpu: 0.0.40
codegen_flags: <defaults>
</compile_context>

<pallas_src>
import functools

import jax
import jax.numpy as jnp
import numpy as np
from jax.experimental import pallas as pl
from jax.experimental.pallas import tpu as pltpu


def match_block_kernel(spt_ref, qry_ref, w1_ref, w2_ref, cw_ref,
                       x2_ref, x1_ref, *, H, W):
    Bblk, C, HWp = spt_ref.shape
    HW = H * W                       # true spatial size (HWp is lane-padded)
    inv_hw = 1.0 / HW

    w1 = w1_ref[...]                 # (Cr, C)  ChannelAttention.fc1 (1x1 conv, no bias)
    w2 = w2_ref[...]                 # (C, Cr)  ChannelAttention.fc2

    # ---- hoisted lane-position iota and masks (padding + conv boundaries) ----
    pos = jax.lax.broadcasted_iota(jnp.int32, (1, HWp), 1)
    if (W & (W - 1)) == 0:
        colp = jnp.bitwise_and(pos, W - 1)
    else:
        colp = jax.lax.rem(pos, W)
    valid = pos < HW                                          # (1, HWp)
    row_masks, col_masks = [], []
    for d in (-1, 0, 1):
        rm = (pos >= max(0, -d) * W) & (pos < min(H, H - d) * W)
        cm = (colp >= max(0, -d)) & (colp < min(W, W - d))
        row_masks.append(rm.astype(jnp.float32))
        col_masks.append(cm.astype(jnp.float32))

    ones_hw = jnp.ones((HWp, 1), jnp.float32)                 # MXU mean over HW
    mean_c = jnp.full((1, C), 1.0 / C, jnp.float32)           # MXU mean over C

    # ---- per-sample pooled stats (mean reductions on the idle MXU) ----------
    pooled_cols, mean_rows, max_rows = [], [], []
    for b in range(Bblk):
        for ref in (spt_ref, qry_ref):
            x = ref[b].astype(jnp.float32)                    # (C, HWp); upcast at load (v5e-safe)
            xm = x if HWp == HW else jnp.where(valid, x, -jnp.inf)
            # Channel-attention pooling: avg via ones-dot (zero pad lanes do
            # not change the sum; divide by the TRUE HW), max via lane reduce.
            pooled_cols.append(
                jnp.dot(x, ones_hw, preferred_element_type=jnp.float32) * inv_hw)
            pooled_cols.append(jnp.max(xm, axis=1, keepdims=True))
            # Spatial-attention input maps: mean over C on the MXU, max on XLU.
            mean_rows.append(jnp.dot(mean_c, x, preferred_element_type=jnp.float32))
            max_rows.append(jnp.max(x, axis=0, keepdims=True))

    # ---- channel attention: one fused 2-dot MLP for the whole block ---------
    # columns per sample b: [avg(spt_b), max(spt_b), avg(qry_b), max(qry_b)]
    pooled = jnp.concatenate(pooled_cols, axis=1)             # (C, 4*Bblk)
    hid = jnp.maximum(
        jnp.dot(w1, pooled, preferred_element_type=jnp.float32), 0.0)  # (Cr, 4B)
    mlp = jnp.dot(w2, hid, preferred_element_type=jnp.float32)          # (C, 4B)

    # ---- spatial attention: batched 9-tap 3x3 conv via lane rolls -----------
    # rows ordered [spt_0, qry_0, spt_1, qry_1, ...]; mean/max channels kept as
    # two separate tensors so no sublane slicing happens inside the tap loop.
    mean_maps = jnp.concatenate(mean_rows, axis=0)            # (2*Bblk, HWp)
    max_maps = jnp.concatenate(max_rows, axis=0)              # (2*Bblk, HWp)
    acc = jnp.zeros((2 * Bblk, HWp), jnp.float32)
    for di in (-1, 0, 1):
        for dj in (-1, 0, 1):
            s = di * W + dj
            m_sh = mean_maps if s == 0 else pltpu.roll(mean_maps, (-s) % HWp, axis=1)
            x_sh = max_maps if s == 0 else pltpu.roll(max_maps, (-s) % HWp, axis=1)
            mask = row_masks[di + 1] * col_masks[dj + 1]      # (1, HWp) 0/1
            w_mean = cw_ref[0 * 9 + (di + 1) * 3 + (dj + 1)]  # SMEM scalars
            w_max = cw_ref[1 * 9 + (di + 1) * 3 + (dj + 1)]
            acc = acc + (w_mean * m_sh + w_max * x_sh) * mask
    sa = jax.nn.sigmoid(acc)                                  # (2*Bblk, HWp)

    # ---- fused per-sample epilogue (single-expression stores) ---------------
    for b in range(Bblk):
        ca_spt = jax.nn.sigmoid(mlp[:, 4 * b + 0:4 * b + 1] + mlp[:, 4 * b + 1:4 * b + 2])
        ca_qry = jax.nn.sigmoid(mlp[:, 4 * b + 2:4 * b + 3] + mlp[:, 4 * b + 3:4 * b + 4])
        sa_spt = sa[2 * b + 0:2 * b + 1]                      # SA(spt_b), (1, HWp)
        sa_qry = sa[2 * b + 1:2 * b + 2]                      # SA(qry_b)
        spt_b = spt_ref[b].astype(jnp.float32)
        qry_b = qry_ref[b].astype(jnp.float32)
        # x2 = spt*CA(qry)*SA(qry) + spt ;  x1 = qry*CA(spt)*SA(spt) + qry
        x2_ref[b] = (spt_b * ca_qry * sa_qry + spt_b).astype(x2_ref.dtype)
        x1_ref[b] = (qry_b * ca_spt * sa_spt + qry_b).astype(x1_ref.dtype)


def _pick_block_batch(batch, bytes_per_sample):
    """Samples per grid step: large enough to reach the >=512 KiB DMA
    efficiency plateau and amortize per-step overhead; small enough that
    2 inputs + 2 outputs double-buffered (8 resident blocks) + weights stay
    well inside v7x's 64 MiB VMEM; capped at 16 so the unrolled per-sample
    loops inside the kernel stay small."""
    plateau = -(-(512 * 1024) // bytes_per_sample)                 # ceil
    vmem_cap = max(1, (36 * 1024 * 1024) // (8 * bytes_per_sample))
    return max(1, min(batch, plateau, vmem_cap, 16))


def match_block_forward(spt, qry, w_fc1, w_fc2, w_sa):
    """Pallas implementation of match_block.forward(spt, qry) -> (x2, x1)."""
    B, C, H, W = spt.shape
    HW = H * W
    HWp = -(-HW // 128) * 128            # lane-dense last dim (unmasked stores)
    dt = spt.dtype

    # Native activation dtype end-to-end (no wrapper-side f32 cast pass).
    spt_f = spt.reshape(B, C, HW)
    qry_f = qry.reshape(B, C, HW)
    if HWp != HW:
        spt_f = jnp.pad(spt_f, ((0, 0), (0, 0), (0, HWp - HW)))
        qry_f = jnp.pad(qry_f, ((0, 0), (0, 0), (0, HWp - HW)))

    w1 = w_fc1.reshape(-1, C).astype(jnp.float32)             # (Cr, C)
    w2 = w_fc2.reshape(C, -1).astype(jnp.float32)             # (C, Cr)
    Cr = w1.shape[0]
    cw_flat = w_sa.reshape(-1).astype(jnp.float32)            # (18,) = (1,2,3,3) flat

    bblk = _pick_block_batch(B, C * HWp * dt.itemsize)
    nsteps = -(-B // bblk)
    Bp = nsteps * bblk
    if Bp != B:                           # uniform blocks: pad batch, slice after
        spt_f = jnp.pad(spt_f, ((0, Bp - B), (0, 0), (0, 0)))
        qry_f = jnp.pad(qry_f, ((0, Bp - B), (0, 0), (0, 0)))

    act_spec = pl.BlockSpec((bblk, C, HWp), lambda b: (b, 0, 0))
    kernel = functools.partial(match_block_kernel, H=H, W=W)

    x2_p, x1_p = pl.pallas_call(
        kernel,
        out_shape=(jax.ShapeDtypeStruct((Bp, C, HWp), dt),
                   jax.ShapeDtypeStruct((Bp, C, HWp), dt)),
        grid=(nsteps,),
        in_specs=[
            act_spec,                                           # spt block
            act_spec,                                           # qry block
            pl.BlockSpec((Cr, C), lambda b: (0, 0)),            # fc1 weight
            pl.BlockSpec((C, Cr), lambda b: (0, 0)),            # fc2 weight
            pl.BlockSpec(memory_space=pltpu.MemorySpace.SMEM),  # 3x3 conv weights
        ],
        out_specs=[act_spec, act_spec],
        compiler_params=pltpu.CompilerParams(
            dimension_semantics=("parallel",),                  # batch blocks independent
            vmem_limit_bytes=48 * 1024 * 1024),                 # explicit, v7x(64MiB)-safe
    )(spt_f, qry_f, w1, w2, cw_flat)

    x2 = x2_p[:B, :, :HW].reshape(B, C, H, W)
    x1 = x1_p[:B, :, :HW].reshape(B, C, H, W)
    return x2, x1


def ref_forward(spt, qry, w_fc1, w_fc2, w_sa):
    """Plain-JAX reference mirroring the PyTorch module semantics."""
    def channel_attention(x):
        avg_p = jnp.mean(x, axis=(2, 3))   # (B, C)
        max_p = jnp.max(x, axis=(2, 3))    # (B, C)

        def mlp(p):
            h = jax.nn.relu(p @ w_fc1.T)
            return h @ w_fc2.T

        return jax.nn.sigmoid(mlp(avg_p) + mlp(max_p))[:, :, None, None]

    def spatial_attention(x):
        avg_c = jnp.mean(x, axis=1, keepdims=True)
        max_c = jnp.max(x, axis=1, keepdims=True)
        z = jnp.concatenate([avg_c, max_c], axis=1)          # (B, 2, H, W)
        y = jax.lax.conv_general_dilated(
            z, w_sa, window_strides=(1, 1), padding=((1, 1), (1, 1)),
            dimension_numbers=("NCHW", "OIHW", "NCHW"))
        return jax.nn.sigmoid(y)

    cw1 = channel_attention(spt)
    cw2 = channel_attention(qry)
    xq = qry * cw1
    xs = spt * cw2
    xq0 = spatial_attention(spt)
    xs0 = spatial_attention(qry)
    x1 = xq * xq0 + qry
    x2 = xs * xs0 + spt
    return x2, x1


if __name__ == "__main__":
    B, C, H, W = 2, 40, 16, 16
    Cr = C // 10  # ChannelAttention reduction ratio = 10

    key = jax.random.PRNGKey(0)
    k1, k2, k3, k4, k5 = jax.random.split(key, 5)
    spt = jax.random.normal(k1, (B, C, H, W), jnp.float32)
    qry = jax.random.normal(k2, (B, C, H, W), jnp.float32)
    # Deterministic synthetic parameters (same shapes as the PyTorch module).
    w_fc1 = jax.random.normal(k3, (Cr, C), jnp.float32) * 0.2       # Conv2d(C, C//10, 1)
    w_fc2 = jax.random.normal(k4, (C, Cr), jnp.float32) * 0.2       # Conv2d(C//10, C, 1)
    w_sa = jax.random.normal(k5, (1, 2, 3, 3), jnp.float32) * 0.3   # Conv2d(2, 1, 3)

    x2, x1 = match_block_forward(spt, qry, w_fc1, w_fc2, w_sa)
    x2 = jax.block_until_ready(x2)
    x1 = jax.block_until_ready(x1)

    r2, r1 = ref_forward(spt, qry, w_fc1, w_fc2, w_sa)
    assert x2.shape == (B, C, H, W) and x1.shape == (B, C, H, W)
    # Slightly relaxed tolerance: the ones-dot mean pooling runs on the MXU
    # (bf16 multiply passes at default precision) vs the pure-f32 XLA reference.
    np.testing.assert_allclose(np.asarray(x2), np.asarray(r2), rtol=3e-4, atol=3e-4)
    np.testing.assert_allclose(np.asarray(x1), np.asarray(r1), rtol=3e-4, atol=3e-4)
    print("KERNEL_OK")
</pallas_src>

<mosaic_0001>
module attributes {stable_mosaic.version = 11 : i64} {
  func.func @match_block_kernel(%arg0: i32, %arg1: memref<2x40x256xf32, #tpu.memory_space<vmem>>, %arg2: memref<2x40x256xf32, #tpu.memory_space<vmem>>, %arg3: memref<4x40xf32, #tpu.memory_space<vmem>>, %arg4: memref<40x4xf32, #tpu.memory_space<vmem>>, %arg5: memref<18xf32, #tpu.memory_space<smem>>, %arg6: memref<2x40x256xf32, #tpu.memory_space<vmem>>, %arg7: memref<2x40x256xf32, #tpu.memory_space<vmem>>) attributes {dimension_semantics = [#tpu.dimension_semantics<parallel>], iteration_bounds = array<i64: 1>, scalar_prefetch = 0 : i64, scratch_operands = 0 : i64, tpu.core_type = #tpu.core_type<tc>, window_params = [{transform_indices = @transform_0, window_bounds = array<i64: 2, 40, 256>}, {transform_indices = @transform_1, window_bounds = array<i64: 2, 40, 256>}, {pipeline_mode = #tpu.pipeline_mode<synchronous>, transform_indices = @transform_2, window_bounds = array<i64: 4, 40>}, {pipeline_mode = #tpu.pipeline_mode<synchronous>, transform_indices = @transform_3, window_bounds = array<i64: 40, 4>}, {transform_indices = @transform_4, window_bounds = array<i64: 18>}, {transform_indices = @transform_5, window_bounds = array<i64: 2, 40, 256>}, {transform_indices = @transform_6, window_bounds = array<i64: 2, 40, 256>}]} {
    %c0 = arith.constant 0 : index
    %c0_0 = arith.constant 0 : index
    %0 = vector.load %arg3[%c0, %c0_0] : memref<4x40xf32, #tpu.memory_space<vmem>>, vector<4x40xf32>
    %c0_1 = arith.constant 0 : index
    %c0_2 = arith.constant 0 : index
    %1 = vector.load %arg4[%c0_1, %c0_2] : memref<40x4xf32, #tpu.memory_space<vmem>>, vector<40x4xf32>
    %2 = tpu.iota {dimensions = array<i32: 1>} : vector<1x256xi32>
    %c15_i32 = arith.constant 15 : i32
    %3 = vector.broadcast %c15_i32 : i32 to vector<1x256xi32>
    %4 = arith.andi %2, %3 : vector<1x256xi32>
    %c16_i32 = arith.constant 16 : i32
    %5 = vector.broadcast %c16_i32 : i32 to vector<1x256xi32>
    %6 = arith.cmpi sge, %2, %5 : vector<1x256xi32>
    %c256_i32 = arith.constant 256 : i32
    %7 = vector.broadcast %c256_i32 : i32 to vector<1x256xi32>
    %8 = arith.cmpi slt, %2, %7 : vector<1x256xi32>
    %9 = arith.andi %6, %8 : vector<1x256xi1>
    %c1_i32 = arith.constant 1 : i32
    %10 = vector.broadcast %c1_i32 : i32 to vector<1x256xi32>
    %11 = arith.cmpi sge, %4, %10 : vector<1x256xi32>
    %c16_i32_3 = arith.constant 16 : i32
    %12 = vector.broadcast %c16_i32_3 : i32 to vector<1x256xi32>
    %13 = arith.cmpi slt, %4, %12 : vector<1x256xi32>
    %14 = arith.andi %11, %13 : vector<1x256xi1>
    %15 = arith.extui %9 : vector<1x256xi1> to vector<1x256xi32>
    %16 = arith.sitofp %15 : vector<1x256xi32> to vector<1x256xf32>
    %17 = arith.extui %14 : vector<1x256xi1> to vector<1x256xi32>
    %18 = arith.sitofp %17 : vector<1x256xi32> to vector<1x256xf32>
    %c0_i32 = arith.constant 0 : i32
    %19 = vector.broadcast %c0_i32 : i32 to vector<1x256xi32>
    %20 = arith.cmpi sge, %2, %19 : vector<1x256xi32>
    %c256_i32_4 = arith.constant 256 : i32
    %21 = vector.broadcast %c256_i32_4 : i32 to vector<1x256xi32>
    %22 = arith.cmpi slt, %2, %21 : vector<1x256xi32>
    %23 = arith.andi %20, %22 : vector<1x256xi1>
    %c0_i32_5 = arith.constant 0 : i32
    %24 = vector.broadcast %c0_i32_5 : i32 to vector<1x256xi32>
    %25 = arith.cmpi sge, %4, %24 : vector<1x256xi32>
    %c16_i32_6 = arith.constant 16 : i32
    %26 = vector.broadcast %c16_i32_6 : i32 to vector<1x256xi32>
    %27 = arith.cmpi slt, %4, %26 : vector<1x256xi32>
    %28 = arith.andi %25, %27 : vector<1x256xi1>
    %29 = arith.extui %23 : vector<1x256xi1> to vector<1x256xi32>
    %30 = arith.sitofp %29 : vector<1x256xi32> to vector<1x256xf32>
    %31 = arith.extui %28 : vector<1x256xi1> to vector<1x256xi32>
    %32 = arith.sitofp %31 : vector<1x256xi32> to vector<1x256xf32>
    %c0_i32_7 = arith.constant 0 : i32
    %33 = vector.broadcast %c0_i32_7 : i32 to vector<1x256xi32>
    %34 = arith.cmpi sge, %2, %33 : vector<1x256xi32>
    %c240_i32 = arith.constant 240 : i32
    %35 = vector.broadcast %c240_i32 : i32 to vector<1x256xi32>
    %36 = arith.cmpi slt, %2, %35 : vector<1x256xi32>
    %37 = arith.andi %34, %36 : vector<1x256xi1>
    %c0_i32_8 = arith.constant 0 : i32
    %38 = vector.broadcast %c0_i32_8 : i32 to vector<1x256xi32>
    %39 = arith.cmpi sge, %4, %38 : vector<1x256xi32>
    %c15_i32_9 = arith.constant 15 : i32
    %40 = vector.broadcast %c15_i32_9 : i32 to vector<1x256xi32>
    %41 = arith.cmpi slt, %4, %40 : vector<1x256xi32>
    %42 = arith.andi %39, %41 : vector<1x256xi1>
    %43 = arith.extui %37 : vector<1x256xi1> to vector<1x256xi32>
    %44 = arith.sitofp %43 : vector<1x256xi32> to vector<1x256xf32>
    %45 = arith.extui %42 : vector<1x256xi1> to vector<1x256xi32>
    %46 = arith.sitofp %45 : vector<1x256xi32> to vector<1x256xf32>
    %cst = arith.constant 1.000000e+00 : f32
    %47 = vector.broadcast %cst : f32 to vector<256x1xf32>
    %cst_10 = arith.constant 2.500000e-02 : f32
    %48 = vector.broadcast %cst_10 : f32 to vector<1x40xf32>
    %c0_11 = arith.constant 0 : index
    %c0_12 = arith.constant 0 : index
    %c0_13 = arith.constant 0 : index
    %49 = vector.load %arg1[%c0_11, %c0_12, %c0_13] : memref<2x40x256xf32, #tpu.memory_space<vmem>>, vector<1x40x256xf32>
    %50 = vector.shape_cast %49 : vector<1x40x256xf32> to vector<40x256xf32>
    %cst_14 = arith.constant dense<0.000000e+00> : vector<40x1xf32>
    %51 = tpu.matmul %50, %47, %cst_14 {dimension_numbers = #tpu.dot_dimension_numbers<[1], [0], [0], [1], [0, 0, 1, 1], [], []>} : vector<40x256xf32>, vector<256x1xf32>, vector<40x1xf32> -> vector<40x1xf32>
    %cst_15 = arith.constant 3.906250e-03 : f32
    %52 = vector.broadcast %cst_15 : f32 to vector<40x1xf32>
    %53 = arith.mulf %51, %52 : vector<40x1xf32>
    %cst_16 = arith.constant dense<0xFF800000> : vector<40xf32>
    %54 = vector.multi_reduction <maximumf>, %50, %cst_16 [1] : vector<40x256xf32> to vector<40xf32>
    %55 = vector.shape_cast %54 : vector<40xf32> to vector<40x1xf32>
    %cst_17 = arith.constant dense<0.000000e+00> : vector<1x256xf32>
    %56 = tpu.matmul %48, %50, %cst_17 {dimension_numbers = #tpu.dot_dimension_numbers<[1], [0], [0], [1], [0, 0, 1, 1], [], []>} : vector<1x40xf32>, vector<40x256xf32>, vector<1x256xf32> -> vector<1x256xf32>
    %cst_18 = arith.constant dense<0xFF800000> : vector<256xf32>
    %57 = vector.multi_reduction <maximumf>, %50, %cst_18 [0] : vector<40x256xf32> to vector<256xf32>
    %58 = vector.shape_cast %57 : vector<256xf32> to vector<1x256xf32>
    %c0_19 = arith.constant 0 : index
    %c0_20 = arith.constant 0 : index
    %c0_21 = arith.constant 0 : index
    %59 = vector.load %arg2[%c0_19, %c0_20, %c0_21] : memref<2x40x256xf32, #tpu.memory_space<vmem>>, vector<1x40x256xf32>
    %60 = vector.shape_cast %59 : vector<1x40x256xf32> to vector<40x256xf32>
    %cst_22 = arith.constant dense<0.000000e+00> : vector<40x1xf32>
    %61 = tpu.matmul %60, %47, %cst_22 {dimension_numbers = #tpu.dot_dimension_numbers<[1], [0], [0], [1], [0, 0, 1, 1], [], []>} : vector<40x256xf32>, vector<256x1xf32>, vector<40x1xf32> -> vector<40x1xf32>
    %cst_23 = arith.constant 3.906250e-03 : f32
    %62 = vector.broadcast %cst_23 : f32 to vector<40x1xf32>
    %63 = arith.mulf %61, %62 : vector<40x1xf32>
    %cst_24 = arith.constant dense<0xFF800000> : vector<40xf32>
    %64 = vector.multi_reduction <maximumf>, %60, %cst_24 [1] : vector<40x256xf32> to vector<40xf32>
    %65 = vector.shape_cast %64 : vector<40xf32> to vector<40x1xf32>
    %cst_25 = arith.constant dense<0.000000e+00> : vector<1x256xf32>
    %66 = tpu.matmul %48, %60, %cst_25 {dimension_numbers = #tpu.dot_dimension_numbers<[1], [0], [0], [1], [0, 0, 1, 1], [], []>} : vector<1x40xf32>, vector<40x256xf32>, vector<1x256xf32> -> vector<1x256xf32>
    %cst_26 = arith.constant dense<0xFF800000> : vector<256xf32>
    %67 = vector.multi_reduction <maximumf>, %60, %cst_26 [0] : vector<40x256xf32> to vector<256xf32>
    %68 = vector.shape_cast %67 : vector<256xf32> to vector<1x256xf32>
    %c1 = arith.constant 1 : index
    %c0_27 = arith.constant 0 : index
    %c0_28 = arith.constant 0 : index
    %69 = vector.load %arg1[%c1, %c0_27, %c0_28] : memref<2x40x256xf32, #tpu.memory_space<vmem>>, vector<1x40x256xf32>
    %70 = vector.shape_cast %69 : vector<1x40x256xf32> to vector<40x256xf32>
    %cst_29 = arith.constant dense<0.000000e+00> : vector<40x1xf32>
    %71 = tpu.matmul %70, %47, %cst_29 {dimension_numbers = #tpu.dot_dimension_numbers<[1], [0], [0], [1], [0, 0, 1, 1], [], []>} : vector<40x256xf32>, vector<256x1xf32>, vector<40x1xf32> -> vector<40x1xf32>
    %cst_30 = arith.constant 3.906250e-03 : f32
    %72 = vector.broadcast %cst_30 : f32 to vector<40x1xf32>
    %73 = arith.mulf %71, %72 : vector<40x1xf32>
    %cst_31 = arith.constant dense<0xFF800000> : vector<40xf32>
    %74 = vector.multi_reduction <maximumf>, %70, %cst_31 [1] : vector<40x256xf32> to vector<40xf32>
    %75 = vector.shape_cast %74 : vector<40xf32> to vector<40x1xf32>
    %cst_32 = arith.constant dense<0.000000e+00> : vector<1x256xf32>
    %76 = tpu.matmul %48, %70, %cst_32 {dimension_numbers = #tpu.dot_dimension_numbers<[1], [0], [0], [1], [0, 0, 1, 1], [], []>} : vector<1x40xf32>, vector<40x256xf32>, vector<1x256xf32> -> vector<1x256xf32>
    %cst_33 = arith.constant dense<0xFF800000> : vector<256xf32>
    %77 = vector.multi_reduction <maximumf>, %70, %cst_33 [0] : vector<40x256xf32> to vector<256xf32>
    %78 = vector.shape_cast %77 : vector<256xf32> to vector<1x256xf32>
    %c1_34 = arith.constant 1 : index
    %c0_35 = arith.constant 0 : index
    %c0_36 = arith.constant 0 : index
    %79 = vector.load %arg2[%c1_34, %c0_35, %c0_36] : memref<2x40x256xf32, #tpu.memory_space<vmem>>, vector<1x40x256xf32>
    %80 = vector.shape_cast %79 : vector<1x40x256xf32> to vector<40x256xf32>
    %cst_37 = arith.constant dense<0.000000e+00> : vector<40x1xf32>
    %81 = tpu.matmul %80, %47, %cst_37 {dimension_numbers = #tpu.dot_dimension_numbers<[1], [0], [0], [1], [0, 0, 1, 1], [], []>} : vector<40x256xf32>, vector<256x1xf32>, vector<40x1xf32> -> vector<40x1xf32>
    %cst_38 = arith.constant 3.906250e-03 : f32
    %82 = vector.broadcast %cst_38 : f32 to vector<40x1xf32>
    %83 = arith.mulf %81, %82 : vector<40x1xf32>
    %cst_39 = arith.constant dense<0xFF800000> : vector<40xf32>
    %84 = vector.multi_reduction <maximumf>, %80, %cst_39 [1] : vector<40x256xf32> to vector<40xf32>
    %85 = vector.shape_cast %84 : vector<40xf32> to vector<40x1xf32>
    %cst_40 = arith.constant dense<0.000000e+00> : vector<1x256xf32>
    %86 = tpu.matmul %48, %80, %cst_40 {dimension_numbers = #tpu.dot_dimension_numbers<[1], [0], [0], [1], [0, 0, 1, 1], [], []>} : vector<1x40xf32>, vector<40x256xf32>, vector<1x256xf32> -> vector<1x256xf32>
    %cst_41 = arith.constant dense<0xFF800000> : vector<256xf32>
    %87 = vector.multi_reduction <maximumf>, %80, %cst_41 [0] : vector<40x256xf32> to vector<256xf32>
    %88 = vector.shape_cast %87 : vector<256xf32> to vector<1x256xf32>
    %89 = tpu.concatenate %53, %55, %63, %65, %73, %75, %83, %85 in 1 : vector<40x1xf32>, vector<40x1xf32>, vector<40x1xf32>, vector<40x1xf32>, vector<40x1xf32>, vector<40x1xf32>, vector<40x1xf32>, vector<40x1xf32> -> vector<40x8xf32>
    %cst_42 = arith.constant dense<0.000000e+00> : vector<4x8xf32>
    %90 = tpu.matmul %0, %89, %cst_42 {dimension_numbers = #tpu.dot_dimension_numbers<[1], [0], [0], [1], [0, 0, 1, 1], [], []>} : vector<4x40xf32>, vector<40x8xf32>, vector<4x8xf32> -> vector<4x8xf32>
    %cst_43 = arith.constant 0.000000e+00 : f32
    %91 = vector.broadcast %cst_43 : f32 to vector<4x8xf32>
    %92 = arith.maximumf %90, %91 : vector<4x8xf32>
    %cst_44 = arith.constant dense<0.000000e+00> : vector<40x8xf32>
    %93 = tpu.matmul %1, %92, %cst_44 {dimension_numbers = #tpu.dot_dimension_numbers<[1], [0], [0], [1], [0, 0, 1, 1], [], []>} : vector<40x4xf32>, vector<4x8xf32>, vector<40x8xf32> -> vector<40x8xf32>
    %94 = tpu.concatenate %56, %66, %76, %86 in 0 : vector<1x256xf32>, vector<1x256xf32>, vector<1x256xf32>, vector<1x256xf32> -> vector<4x256xf32>
    %95 = tpu.concatenate %58, %68, %78, %88 in 0 : vector<1x256xf32>, vector<1x256xf32>, vector<1x256xf32>, vector<1x256xf32> -> vector<4x256xf32>
    %cst_45 = arith.constant 0.000000e+00 : f32
    %96 = vector.broadcast %cst_45 : f32 to vector<4x256xf32>
    %c17_i32 = arith.constant 17 : i32
    %97 = tpu.dynamic_rotate %94 by %c17_i32 dim 1 : vector<4x256xf32>, i32 -> vector<4x256xf32>
    %c17_i32_46 = arith.constant 17 : i32
    %98 = tpu.dynamic_rotate %95 by %c17_i32_46 dim 1 : vector<4x256xf32>, i32 -> vector<4x256xf32>
    %99 = arith.mulf %16, %18 : vector<1x256xf32>
    %c0_47 = arith.constant 0 : index
    %100 = memref.load %arg5[%c0_47] : memref<18xf32, #tpu.memory_space<smem>>
    %c9 = arith.constant 9 : index
    %101 = memref.load %arg5[%c9] : memref<18xf32, #tpu.memory_space<smem>>
    %102 = vector.broadcast %100 : f32 to vector<4x256xf32>
    %103 = arith.mulf %102, %97 : vector<4x256xf32>
    %104 = vector.broadcast %101 : f32 to vector<4x256xf32>
    %105 = arith.mulf %104, %98 : vector<4x256xf32>
    %106 = arith.addf %103, %105 : vector<4x256xf32>
    %107 = vector.broadcast %99 : vector<1x256xf32> to vector<4x256xf32>
    %108 = arith.mulf %106, %107 : vector<4x256xf32>
    %109 = arith.addf %96, %108 : vector<4x256xf32>
    %c16_i32_48 = arith.constant 16 : i32
    %110 = tpu.dynamic_rotate %94 by %c16_i32_48 dim 1 : vector<4x256xf32>, i32 -> vector<4x256xf32>
    %c16_i32_49 = arith.constant 16 : i32
    %111 = tpu.dynamic_rotate %95 by %c16_i32_49 dim 1 : vector<4x256xf32>, i32 -> vector<4x256xf32>
    %112 = arith.mulf %16, %32 : vector<1x256xf32>
    %c1_50 = arith.constant 1 : index
    %113 = memref.load %arg5[%c1_50] : memref<18xf32, #tpu.memory_space<smem>>
    %c10 = arith.constant 10 : index
    %114 = memref.load %arg5[%c10] : memref<18xf32, #tpu.memory_space<smem>>
    %115 = vector.broadcast %113 : f32 to vector<4x256xf32>
    %116 = arith.mulf %115, %110 : vector<4x256xf32>
    %117 = vector.broadcast %114 : f32 to vector<4x256xf32>
    %118 = arith.mulf %117, %111 : vector<4x256xf32>
    %119 = arith.addf %116, %118 : vector<4x256xf32>
    %120 = vector.broadcast %112 : vector<1x256xf32> to vector<4x256xf32>
    %121 = arith.mulf %119, %120 : vector<4x256xf32>
    %122 = arith.addf %109, %121 : vector<4x256xf32>
    %c15_i32_51 = arith.constant 15 : i32
    %123 = tpu.dynamic_rotate %94 by %c15_i32_51 dim 1 : vector<4x256xf32>, i32 -> vector<4x256xf32>
    %c15_i32_52 = arith.constant 15 : i32
    %124 = tpu.dynamic_rotate %95 by %c15_i32_52 dim 1 : vector<4x256xf32>, i32 -> vector<4x256xf32>
    %125 = arith.mulf %16, %46 : vector<1x256xf32>
    %c2 = arith.constant 2 : index
    %126 = memref.load %arg5[%c2] : memref<18xf32, #tpu.memory_space<smem>>
    %c11 = arith.constant 11 : index
    %127 = memref.load %arg5[%c11] : memref<18xf32, #tpu.memory_space<smem>>
    %128 = vector.broadcast %126 : f32 to vector<4x256xf32>
    %129 = arith.mulf %128, %123 : vector<4x256xf32>
    %130 = vector.broadcast %127 : f32 to vector<4x256xf32>
    %131 = arith.mulf %130, %124 : vector<4x256xf32>
    %132 = arith.addf %129, %131 : vector<4x256xf32>
    %133 = vector.broadcast %125 : vector<1x256xf32> to vector<4x256xf32>
    %134 = arith.mulf %132, %133 : vector<4x256xf32>
    %135 = arith.addf %122, %134 : vector<4x256xf32>
    %c1_i32_53 = arith.constant 1 : i32
    %136 = tpu.dynamic_rotate %94 by %c1_i32_53 dim 1 : vector<4x256xf32>, i32 -> vector<4x256xf32>
    %c1_i32_54 = arith.constant 1 : i32
    %137 = tpu.dynamic_rotate %95 by %c1_i32_54 dim 1 : vector<4x256xf32>, i32 -> vector<4x256xf32>
    %138 = arith.mulf %30, %18 : vector<1x256xf32>
    %c3 = arith.constant 3 : index
    %139 = memref.load %arg5[%c3] : memref<18xf32, #tpu.memory_space<smem>>
    %c12 = arith.constant 12 : index
    %140 = memref.load %arg5[%c12] : memref<18xf32, #tpu.memory_space<smem>>
    %141 = vector.broadcast %139 : f32 to vector<4x256xf32>
    %142 = arith.mulf %141, %136 : vector<4x256xf32>
    %143 = vector.broadcast %140 : f32 to vector<4x256xf32>
    %144 = arith.mulf %143, %137 : vector<4x256xf32>
    %145 = arith.addf %142, %144 : vector<4x256xf32>
    %146 = vector.broadcast %138 : vector<1x256xf32> to vector<4x256xf32>
    %147 = arith.mulf %145, %146 : vector<4x256xf32>
    %148 = arith.addf %135, %147 : vector<4x256xf32>
    %149 = arith.mulf %30, %32 : vector<1x256xf32>
    %c4 = arith.constant 4 : index
    %150 = memref.load %arg5[%c4] : memref<18xf32, #tpu.memory_space<smem>>
    %c13 = arith.constant 13 : index
    %151 = memref.load %arg5[%c13] : memref<18xf32, #tpu.memory_space<smem>>
    %152 = vector.broadcast %150 : f32 to vector<4x256xf32>
    %153 = arith.mulf %152, %94 : vector<4x256xf32>
    %154 = vector.broadcast %151 : f32 to vector<4x256xf32>
    %155 = arith.mulf %154, %95 : vector<4x256xf32>
    %156 = arith.addf %153, %155 : vector<4x256xf32>
    %157 = vector.broadcast %149 : vector<1x256xf32> to vector<4x256xf32>
    %158 = arith.mulf %156, %157 : vector<4x256xf32>
    %159 = arith.addf %148, %158 : vector<4x256xf32>
    %c255_i32 = arith.constant 255 : i32
    %160 = tpu.dynamic_rotate %94 by %c255_i32 dim 1 : vector<4x256xf32>, i32 -> vector<4x256xf32>
    %c255_i32_55 = arith.constant 255 : i32
    %161 = tpu.dynamic_rotate %95 by %c255_i32_55 dim 1 : vector<4x256xf32>, i32 -> vector<4x256xf32>
    %162 = arith.mulf %30, %46 : vector<1x256xf32>
    %c5 = arith.constant 5 : index
    %163 = memref.load %arg5[%c5] : memref<18xf32, #tpu.memory_space<smem>>
    %c14 = arith.constant 14 : index
    %164 = memref.load %arg5[%c14] : memref<18xf32, #tpu.memory_space<smem>>
    %165 = vector.broadcast %163 : f32 to vector<4x256xf32>
    %166 = arith.mulf %165, %160 : vector<4x256xf32>
    %167 = vector.broadcast %164 : f32 to vector<4x256xf32>
    %168 = arith.mulf %167, %161 : vector<4x256xf32>
    %169 = arith.addf %166, %168 : vector<4x256xf32>
    %170 = vector.broadcast %162 : vector<1x256xf32> to vector<4x256xf32>
    %171 = arith.mulf %169, %170 : vector<4x256xf32>
    %172 = arith.addf %159, %171 : vector<4x256xf32>
    %c241_i32 = arith.constant 241 : i32
    %173 = tpu.dynamic_rotate %94 by %c241_i32 dim 1 : vector<4x256xf32>, i32 -> vector<4x256xf32>
    %c241_i32_56 = arith.constant 241 : i32
    %174 = tpu.dynamic_rotate %95 by %c241_i32_56 dim 1 : vector<4x256xf32>, i32 -> vector<4x256xf32>
    %175 = arith.mulf %44, %18 : vector<1x256xf32>
    %c6 = arith.constant 6 : index
    %176 = memref.load %arg5[%c6] : memref<18xf32, #tpu.memory_space<smem>>
    %c15 = arith.constant 15 : index
    %177 = memref.load %arg5[%c15] : memref<18xf32, #tpu.memory_space<smem>>
    %178 = vector.broadcast %176 : f32 to vector<4x256xf32>
    %179 = arith.mulf %178, %173 : vector<4x256xf32>
    %180 = vector.broadcast %177 : f32 to vector<4x256xf32>
    %181 = arith.mulf %180, %174 : vector<4x256xf32>
    %182 = arith.addf %179, %181 : vector<4x256xf32>
    %183 = vector.broadcast %175 : vector<1x256xf32> to vector<4x256xf32>
    %184 = arith.mulf %182, %183 : vector<4x256xf32>
    %185 = arith.addf %172, %184 : vector<4x256xf32>
    %c240_i32_57 = arith.constant 240 : i32
    %186 = tpu.dynamic_rotate %94 by %c240_i32_57 dim 1 : vector<4x256xf32>, i32 -> vector<4x256xf32>
    %c240_i32_58 = arith.constant 240 : i32
    %187 = tpu.dynamic_rotate %95 by %c240_i32_58 dim 1 : vector<4x256xf32>, i32 -> vector<4x256xf32>
    %188 = arith.mulf %44, %32 : vector<1x256xf32>
    %c7 = arith.constant 7 : index
    %189 = memref.load %arg5[%c7] : memref<18xf32, #tpu.memory_space<smem>>
    %c16 = arith.constant 16 : index
    %190 = memref.load %arg5[%c16] : memref<18xf32, #tpu.memory_space<smem>>
    %191 = vector.broadcast %189 : f32 to vector<4x256xf32>
    %192 = arith.mulf %191, %186 : vector<4x256xf32>
    %193 = vector.broadcast %190 : f32 to vector<4x256xf32>
    %194 = arith.mulf %193, %187 : vector<4x256xf32>
    %195 = arith.addf %192, %194 : vector<4x256xf32>
    %196 = vector.broadcast %188 : vector<1x256xf32> to vector<4x256xf32>
    %197 = arith.mulf %195, %196 : vector<4x256xf32>
    %198 = arith.addf %185, %197 : vector<4x256xf32>
    %c239_i32 = arith.constant 239 : i32
    %199 = tpu.dynamic_rotate %94 by %c239_i32 dim 1 : vector<4x256xf32>, i32 -> vector<4x256xf32>
    %c239_i32_59 = arith.constant 239 : i32
    %200 = tpu.dynamic_rotate %95 by %c239_i32_59 dim 1 : vector<4x256xf32>, i32 -> vector<4x256xf32>
    %201 = arith.mulf %44, %46 : vector<1x256xf32>
    %c8 = arith.constant 8 : index
    %202 = memref.load %arg5[%c8] : memref<18xf32, #tpu.memory_space<smem>>
    %c17 = arith.constant 17 : index
    %203 = memref.load %arg5[%c17] : memref<18xf32, #tpu.memory_space<smem>>
    %204 = vector.broadcast %202 : f32 to vector<4x256xf32>
    %205 = arith.mulf %204, %199 : vector<4x256xf32>
    %206 = vector.broadcast %203 : f32 to vector<4x256xf32>
    %207 = arith.mulf %206, %200 : vector<4x256xf32>
    %208 = arith.addf %205, %207 : vector<4x256xf32>
    %209 = vector.broadcast %201 : vector<1x256xf32> to vector<4x256xf32>
    %210 = arith.mulf %208, %209 : vector<4x256xf32>
    %211 = arith.addf %198, %210 : vector<4x256xf32>
    %212 = arith.negf %211 : vector<4x256xf32>
    %213 = math.exp %212 : vector<4x256xf32>
    %cst_60 = arith.constant 1.000000e+00 : f32
    %214 = vector.broadcast %cst_60 : f32 to vector<4x256xf32>
    %215 = arith.addf %214, %213 : vector<4x256xf32>
    %216 = arith.divf %214, %215 : vector<4x256xf32>
    %217 = vector.extract_strided_slice %93 {offsets = [0, 0], sizes = [40, 1], strides = [1, 1]} : vector<40x8xf32> to vector<40x1xf32>
    %218 = vector.extract_strided_slice %93 {offsets = [0, 1], sizes = [40, 1], strides = [1, 1]} : vector<40x8xf32> to vector<40x1xf32>
    %219 = arith.addf %217, %218 : vector<40x1xf32>
    %220 = arith.negf %219 : vector<40x1xf32>
    %221 = math.exp %220 : vector<40x1xf32>
    %cst_61 = arith.constant 1.000000e+00 : f32
    %222 = vector.broadcast %cst_61 : f32 to vector<40x1xf32>
    %223 = arith.addf %222, %221 : vector<40x1xf32>
    %224 = arith.divf %222, %223 : vector<40x1xf32>
    %225 = vector.extract_strided_slice %93 {offsets = [0, 2], sizes = [40, 1], strides = [1, 1]} : vector<40x8xf32> to vector<40x1xf32>
    %226 = vector.extract_strided_slice %93 {offsets = [0, 3], sizes = [40, 1], strides = [1, 1]} : vector<40x8xf32> to vector<40x1xf32>
    %227 = arith.addf %225, %226 : vector<40x1xf32>
    %228 = arith.negf %227 : vector<40x1xf32>
    %229 = math.exp %228 : vector<40x1xf32>
    %cst_62 = arith.constant 1.000000e+00 : f32
    %230 = vector.broadcast %cst_62 : f32 to vector<40x1xf32>
    %231 = arith.addf %230, %229 : vector<40x1xf32>
    %232 = arith.divf %230, %231 : vector<40x1xf32>
    %233 = vector.extract_strided_slice %216 {offsets = [0, 0], sizes = [1, 256], strides = [1, 1]} : vector<4x256xf32> to vector<1x256xf32>
    %234 = vector.extract_strided_slice %216 {offsets = [1, 0], sizes = [1, 256], strides = [1, 1]} : vector<4x256xf32> to vector<1x256xf32>
    %c0_63 = arith.constant 0 : index
    %c0_64 = arith.constant 0 : index
    %c0_65 = arith.constant 0 : index
    %235 = vector.load %arg1[%c0_63, %c0_64, %c0_65] : memref<2x40x256xf32, #tpu.memory_space<vmem>>, vector<1x40x256xf32>
    %236 = vector.shape_cast %235 : vector<1x40x256xf32> to vector<40x256xf32>
    %c0_66 = arith.constant 0 : index
    %c0_67 = arith.constant 0 : index
    %c0_68 = arith.constant 0 : index
    %237 = vector.load %arg2[%c0_66, %c0_67, %c0_68] : memref<2x40x256xf32, #tpu.memory_space<vmem>>, vector<1x40x256xf32>
    %238 = vector.shape_cast %237 : vector<1x40x256xf32> to vector<40x256xf32>
    %239 = vector.broadcast %232 : vector<40x1xf32> to vector<40x256xf32>
    %240 = arith.mulf %236, %239 : vector<40x256xf32>
    %241 = vector.broadcast %234 : vector<1x256xf32> to vector<40x256xf32>
    %242 = arith.mulf %240, %241 : vector<40x256xf32>
    %243 = arith.addf %242, %236 : vector<40x256xf32>
    %c0_69 = arith.constant 0 : index
    %c0_70 = arith.constant 0 : index
    %c0_71 = arith.constant 0 : index
    %244 = vector.load %arg6[%c0_69, %c0_70, %c0_71] : memref<2x40x256xf32, #tpu.memory_space<vmem>>, vector<1x40x256xf32>
    %245 = vector.shape_cast %244 : vector<1x40x256xf32> to vector<40x256xf32>
    %246 = vector.shape_cast %243 : vector<40x256xf32> to vector<1x40x256xf32>
    tpu.vector_store %arg6[%c0_69, %c0_70, %c0_71], %246 {strides = array<i32>} : memref<2x40x256xf32, #tpu.memory_space<vmem>>, vector<1x40x256xf32>,
    %247 = vector.broadcast %224 : vector<40x1xf32> to vector<40x256xf32>
    %248 = arith.mulf %238, %247 : vector<40x256xf32>
    %249 = vector.broadcast %233 : vector<1x256xf32> to vector<40x256xf32>
    %250 = arith.mulf %248, %249 : vector<40x256xf32>
    %251 = arith.addf %250, %238 : vector<40x256xf32>
    %c0_72 = arith.constant 0 : index
    %c0_73 = arith.constant 0 : index
    %c0_74 = arith.constant 0 : index
    %252 = vector.load %arg7[%c0_72, %c0_73, %c0_74] : memref<2x40x256xf32, #tpu.memory_space<vmem>>, vector<1x40x256xf32>
    %253 = vector.shape_cast %252 : vector<1x40x256xf32> to vector<40x256xf32>
    %254 = vector.shape_cast %251 : vector<40x256xf32> to vector<1x40x256xf32>
    tpu.vector_store %arg7[%c0_72, %c0_73, %c0_74], %254 {strides = array<i32>} : memref<2x40x256xf32, #tpu.memory_space<vmem>>, vector<1x40x256xf32>,
    %255 = vector.extract_strided_slice %93 {offsets = [0, 4], sizes = [40, 1], strides = [1, 1]} : vector<40x8xf32> to vector<40x1xf32>
    %256 = vector.extract_strided_slice %93 {offsets = [0, 5], sizes = [40, 1], strides = [1, 1]} : vector<40x8xf32> to vector<40x1xf32>
    %257 = arith.addf %255, %256 : vector<40x1xf32>
    %258 = arith.negf %257 : vector<40x1xf32>
    %259 = math.exp %258 : vector<40x1xf32>
    %cst_75 = arith.constant 1.000000e+00 : f32
    %260 = vector.broadcast %cst_75 : f32 to vector<40x1xf32>
    %261 = arith.addf %260, %259 : vector<40x1xf32>
    %262 = arith.divf %260, %261 : vector<40x1xf32>
    %263 = vector.extract_strided_slice %93 {offsets = [0, 6], sizes = [40, 1], strides = [1, 1]} : vector<40x8xf32> to vector<40x1xf32>
    %264 = vector.extract_strided_slice %93 {offsets = [0, 7], sizes = [40, 1], strides = [1, 1]} : vector<40x8xf32> to vector<40x1xf32>
    %265 = arith.addf %263, %264 : vector<40x1xf32>
    %266 = arith.negf %265 : vector<40x1xf32>
    %267 = math.exp %266 : vector<40x1xf32>
    %cst_76 = arith.constant 1.000000e+00 : f32
    %268 = vector.broadcast %cst_76 : f32 to vector<40x1xf32>
    %269 = arith.addf %268, %267 : vector<40x1xf32>
    %270 = arith.divf %268, %269 : vector<40x1xf32>
    %271 = vector.extract_strided_slice %216 {offsets = [2, 0], sizes = [1, 256], strides = [1, 1]} : vector<4x256xf32> to vector<1x256xf32>
    %272 = vector.extract_strided_slice %216 {offsets = [3, 0], sizes = [1, 256], strides = [1, 1]} : vector<4x256xf32> to vector<1x256xf32>
    %c1_77 = arith.constant 1 : index
    %c0_78 = arith.constant 0 : index
    %c0_79 = arith.constant 0 : index
    %273 = vector.load %arg1[%c1_77, %c0_78, %c0_79] : memref<2x40x256xf32, #tpu.memory_space<vmem>>, vector<1x40x256xf32>
    %274 = vector.shape_cast %273 : vector<1x40x256xf32> to vector<40x256xf32>
    %c1_80 = arith.constant 1 : index
    %c0_81 = arith.constant 0 : index
    %c0_82 = arith.constant 0 : index
    %275 = vector.load %arg2[%c1_80, %c0_81, %c0_82] : memref<2x40x256xf32, #tpu.memory_space<vmem>>, vector<1x40x256xf32>
    %276 = vector.shape_cast %275 : vector<1x40x256xf32> to vector<40x256xf32>
    %277 = vector.broadcast %270 : vector<40x1xf32> to vector<40x256xf32>
    %278 = arith.mulf %274, %277 : vector<40x256xf32>
    %279 = vector.broadcast %272 : vector<1x256xf32> to vector<40x256xf32>
    %280 = arith.mulf %278, %279 : vector<40x256xf32>
    %281 = arith.addf %280, %274 : vector<40x256xf32>
    %c1_83 = arith.constant 1 : index
    %c0_84 = arith.constant 0 : index
    %c0_85 = arith.constant 0 : index
    %282 = vector.load %arg6[%c1_83, %c0_84, %c0_85] : memref<2x40x256xf32, #tpu.memory_space<vmem>>, vector<1x40x256xf32>
    %283 = vector.shape_cast %282 : vector<1x40x256xf32> to vector<40x256xf32>
    %284 = vector.shape_cast %281 : vector<40x256xf32> to vector<1x40x256xf32>
    tpu.vector_store %arg6[%c1_83, %c0_84, %c0_85], %284 {strides = array<i32>} : memref<2x40x256xf32, #tpu.memory_space<vmem>>, vector<1x40x256xf32>,
    %285 = vector.broadcast %262 : vector<40x1xf32> to vector<40x256xf32>
    %286 = arith.mulf %276, %285 : vector<40x256xf32>
    %287 = vector.broadcast %271 : vector<1x256xf32> to vector<40x256xf32>
    %288 = arith.mulf %286, %287 : vector<40x256xf32>
    %289 = arith.addf %288, %276 : vector<40x256xf32>
    %c1_86 = arith.constant 1 : index
    %c0_87 = arith.constant 0 : index
    %c0_88 = arith.constant 0 : index
    %290 = vector.load %arg7[%c1_86, %c0_87, %c0_88] : memref<2x40x256xf32, #tpu.memory_space<vmem>>, vector<1x40x256xf32>
    %291 = vector.shape_cast %290 : vector<1x40x256xf32> to vector<40x256xf32>
    %292 = vector.shape_cast %289 : vector<40x256xf32> to vector<1x40x256xf32>
    tpu.vector_store %arg7[%c1_86, %c0_87, %c0_88], %292 {strides = array<i32>} : memref<2x40x256xf32, #tpu.memory_space<vmem>>, vector<1x40x256xf32>,
    return
  }
  func.func @transform_0(%arg0: i32) -> (i32, i32, i32) {
    %c0_i32 = arith.constant 0 : i32
    %c0_i32_0 = arith.constant 0 : i32
    %c0_i32_1 = arith.constant 0 : i32
    return %arg0, %c0_i32, %c0_i32_0 : i32, i32, i32
  }
  func.func @transform_1(%arg0: i32) -> (i32, i32, i32) {
    %c0_i32 = arith.constant 0 : i32
    %c0_i32_0 = arith.constant 0 : i32
    %c0_i32_1 = arith.constant 0 : i32
    return %arg0, %c0_i32, %c0_i32_0 : i32, i32, i32
  }
  func.func @transform_2(%arg0: i32) -> (i32, i32) {
    %c0_i32 = arith.constant 0 : i32
    %c0_i32_0 = arith.constant 0 : i32
    %c0_i32_1 = arith.constant 0 : i32
    return %c0_i32, %c0_i32_0 : i32, i32
  }
  func.func @transform_3(%arg0: i32) -> (i32, i32) {
    %c0_i32 = arith.constant 0 : i32
    %c0_i32_0 = arith.constant 0 : i32
    %c0_i32_1 = arith.constant 0 : i32
    return %c0_i32, %c0_i32_0 : i32, i32
  }
  func.func @transform_4(%arg0: i32) -> i32 {
    %c0_i32 = arith.constant 0 : i32
    %c0_i32_0 = arith.constant 0 : i32
    return %c0_i32 : i32
  }
  func.func @transform_5(%arg0: i32) -> (i32, i32, i32) {
    %c0_i32 = arith.constant 0 : i32
    %c0_i32_0 = arith.constant 0 : i32
    %c0_i32_1 = arith.constant 0 : i32
    return %arg0, %c0_i32, %c0_i32_0 : i32, i32, i32
  }
  func.func @transform_6(%arg0: i32) -> (i32, i32, i32) {
    %c0_i32 = arith.constant 0 : i32
    %c0_i32_0 = arith.constant 0 : i32
    %c0_i32_1 = arith.constant 0 : i32
    return %arg0, %c0_i32, %c0_i32_0 : i32, i32, i32
  }
}

</mosaic_0001>

<bundles_post_ra>
// kernel: tpu_custom_call.1
= control target key start
LH: loop header
LB: loop body
LE: loop exit
PB: predicated region body
PF: predicated region fallthrough
CT: control target
= control target key end

     0   :  { %12 = vsyncpa [#allocation3], 0  ;;  %s3407_s0 = inlined_call_operand.hbm [shape: f32[2,40,256], index: 0, kind: input, shape index: {}]   ;;  %s3408_s1 = inlined_call_operand.hbm [shape: f32[2,40,256], index: 1, kind: input, shape index: {}]   ;;  %s3409_s2 = inlined_call_operand.vmem [shape: f32[4,40], index: 2, kind: input, shape index: {}]   ;;  %s3410_s3 = inlined_call_operand.vmem [shape: f32[40,4], index: 3, kind: input, shape index: {}]   ;;  %s3411_s4 = inlined_call_operand.vmem [shape: f32[18], index: 4, kind: input, shape index: {}]   ;;  %s3412_s5 = inlined_call_operand.hbm [shape: f32[2,40,256], index: 5, kind: output, shape index: {0}]   ;;  %s3413_s6 = inlined_call_operand.hbm [shape: f32[2,40,256], index: 6, kind: output, shape index: {1}]  }
   0x1   :  { %13 = vsyncpa [#allocation7], 0 }
   0x2   :  { %14 = vsyncpa [#allocation5], 0 }
   0x3   :  { %15 = vsyncpa [#allocation4], 0 }
   0x4   :  { %16 = vsyncpa [#allocation11], 0  ;;  %s2552_s21 = smov [#allocation2]   ;;  %s2442_s25 = scalar_lea.hbm %s3407_s0, 2560 }
   0x5   :  { %s22_s22 = sshll.u32 %s2552_s21, 4  ;;  %p2443_p0 = scmp.ne.s32.totalorder %s3407_s0, %s2442_s25  ;;  %s23_s22 = int_to_ptr.vmem [resolvable:$true] %s22_s22 }
   0x6   :  { %p2446_p1 = scmp.lt.u32.totalorder %s2442_s25, %s3407_s0 }
   0x8   :  { %p2448_p2 = pnand %p2446_p1, %p2443_p0 }
   0xa   :  { %2451 = shalt.err (!%p2448_p2)
}
   0xb   :  { %s2452_s30 = scalar_lea.vmem %s23_s22, 2560  ;;  %p2457_p4 = scmp.lt.s32.totalorder %s23_s22, %s23_s22 }
   0xc   :  { %p2453_p3 = scmp.ne.s32.totalorder %s23_s22, %s2452_s30  ;;  %p2458_p5 = scmp.lt.s32.totalorder %s2452_s30, %s2452_s30 }
   0xe   :  { %p2459_p6 = por %p2458_p5, %p2457_p4 }
  0x10   :  { %p2460_p7 = pnand %p2459_p6, %p2453_p3 }
  0x12   :  { %2463 = shalt.err (!%p2460_p7)
}
  0x13   :  { %s2553_s7 = smov 256   ;;  %s2554_s8 = smov 16  }
  0x14   :  { %28 = dma.hbm_to_vmem [thread:$0]  %s3407_s0, 2560, %s23_s22, [#allocation3], %s2553_s7, %s2553_s7, %s2554_s8  }
  0x15   :  { %s2555_s11 = smov [#allocation6]   ;;  %s51_s15 = sshll.u32 %s3411_s4, 4  ;;  %s52_s15 = int_to_ptr.vmem [resolvable:$true] %s51_s15 }
  0x16   :  { %s34_s12 = sshll.u32 %s2555_s11, 4  ;;  %s2464_s18 = scalar_lea.hbm %s3408_s1, 2560  ;;  %s35_s12 = int_to_ptr.vmem [resolvable:$true] %s34_s12 }
  0x17   :  { %p2465_p8 = scmp.ne.s32.totalorder %s3408_s1, %s2464_s18  ;;  %p2468_p9 = scmp.lt.u32.totalorder %s2464_s18, %s3408_s1 }
  0x19   :  { %p2470_p10 = pnand %p2468_p9, %p2465_p8 }
  0x1b   :  { %2473 = shalt.err (!%p2470_p10)
}
  0x1c   :  { %s2474_s0 = scalar_lea.vmem %s35_s12, 2560  ;;  %p2479_p12 = scmp.lt.s32.totalorder %s35_s12, %s35_s12 }
  0x1d   :  { %p2475_p11 = scmp.ne.s32.totalorder %s35_s12, %s2474_s0  ;;  %p2480_p13 = scmp.lt.s32.totalorder %s2474_s0, %s2474_s0 }
  0x1f   :  { %p2481_p0 = por %p2480_p13, %p2479_p12 }
  0x21   :  { %p2482_p1 = pnand %p2481_p0, %p2475_p11 }
  0x23   :  { %2485 = shalt.err (!%p2482_p1)
}
  0x24   :  { %40 = dma.hbm_to_vmem [thread:$0]  %s3408_s1, 2560, %s35_s12, [#allocation7], %s2553_s7, %s2553_s7, %s2554_s8  }
  0x25   :  { %s2486_s24 = scalar_lea.vmem %s52_s15, 16  ;;  %p2491_p3 = scmp.lt.s32.totalorder %s52_s15, %s52_s15 }
  0x26   :  { %p2487_p2 = scmp.ne.s32.totalorder %s52_s15, %s2486_s24  ;;  %p2492_p4 = scmp.lt.s32.totalorder %s2486_s24, %s2486_s24 }
  0x28   :  { %p2493_p5 = por %p2492_p4, %p2491_p3 }
  0x2a   :  { %p2494_p6 = pnand %p2493_p5, %p2487_p2 }
  0x2c   :  { %2497 = shalt.err (!%p2494_p6)
}
  0x2d   :  { %s2556_s25 = smov [#allocation8]  }
  0x2e   :  { %54 = dma.vmem_to_smem %s52_s15, 16, %s2556_s25, [#allocation5]  }
  0x2f   :  { %2542 = dma.done.wait [#allocation3], 2560  }
  0x30   :  { %2543 = vsyncadd [#allocation3], 4294964736 }
  0x31   :  { %2544 = dma.done.wait [#allocation7], 2560  }
  0x32   :  { %2545 = vsyncadd [#allocation7], 4294964736 }
  0x33   :  { %2546 = dma.done.wait [#allocation5], 16  }
  0x34   :  { %2547 = vsyncadd [#allocation5], 4294967280 }
  0x35   :  { %64 = sfence }
  0x36   :  { %v2646_v0 = vld [vmem:[#allocation2 + $0x8] sm:$0xff]  ;;  %v2648_v1 = vld [vmem:[#allocation2 + $0x18] sm:$0xff]  ;;  %v2650_v2 = vld [vmem:[#allocation2] sm:$0xff]  ;;  %v2557_v3 = vmov 1.0|1.0   ;;  %v2558_v8 = vmov 0.0  }
  0x37   :  { %2216 = vmatprep.subr.bf16.mxu0 %v2557_v3  ;;  %v2232_v4 = vpack.c.bf16 %v2648_v1, %v2646_v0  ;;  %v2655_v5 = vld [vmem:[#allocation2 + $0x10] sm:$0xff]  ;;  %v2657_v6 = vld [vmem:[#allocation2 + $0x28] sm:$0xff]  ;;  %v2659_v7 = vld [vmem:[#allocation2 + $0x38] sm:$0xff]  ;;  %316 = vmatprep.mubr.f32.mxu1 %v2558_v8  ;;  %v233_v9 = vmax.f32 %v2650_v2, %v2646_v0  ;;  %vm248_vm0 = vcmask 326656   ;;  %v2559_v19 = vmov 0.025  }
  0x38   :  { %2217 = vmatpush3.bf16.msra.mxu0 %v2557_v3  ;;  %v2234_v10 = vpack.c.bf16 %v2655_v5, %v2650_v2  ;;  %v2236_v11 = vpack.c.bf16 %v2659_v7, %v2657_v6  ;;  %v2669_v12 = vld [vmem:[#allocation2 + $0x20] sm:$0xff]  ;;  %v2671_v13 = vld [vmem:[#allocation2 + $0x30] sm:$0xff]  ;;  %202 = vmatprep.mubr.f32.mxu0 %v2646_v0  ;;  %v236_v15 = vmax.f32 %v2655_v5, %v2648_v1  ;;  %v2680_v16 = vld [vmem:[#allocation2 + $0x48] sm:$0xff]  ;;  %vm1281_vm1 = vcmask 1040384   ;;  %s2560_s1 = smov 2   ;;  %s2561_s26 = smov 4  }
  0x39   :  { %2233 = vmatprep.subr.bf16.mxu1 %v2232_v4  ;;  %2218 = vmatprep.subr.bf16.mxu0 %v2557_v3  ;;  %v2238_v14 = vpack.c.bf16 %v2671_v13, %v2669_v12  ;;  %v2684_v17 = vld [vmem:[#allocation2 + $0x40] sm:$0xff]  ;;  %v239_v18 = vmax.f32 %v2669_v12, %v2657_v6  ;;  %v2696_v20 = vld [vmem:[#allocation6 + $0x8] sm:$0xff]  ;;  %v2702_v22 = vld [vmem:[#allocation2 + $0x58] sm:$0xff]  ;;  %v242_v35 = vmax.f32 %v2671_v13, %v2659_v7  ;;  %vm1284_vm2 = vcmask 1041408   ;;  %s2563_s27 = smov 6   ;;  %s2565_s28 = smov 17  }
  0x3a   :  { %2235 = vmatpush1.bf16.msra.mxu1 %v2234_v10  ;;  %234 = vmax.xlane.f32.xlu0 %v233_v9  ;;  %v2700_v21 = vld [vmem:[#allocation6] sm:$0xff]  ;;  %v2704_v23 = vld [vmem:[#allocation2 + $0x50] sm:$0xff]  ;;  %v2713_v26 = vld [vmem:[#allocation6 + $0x18] sm:$0xff]  ;;  %v245_v47 = vmax.f32 %v2684_v17, %v2680_v16  ;;  %vm1287_vm3 = vcmask 1042432   ;;  %vm2564_vm4 = vmmov 0   ;;  %s2566_s29 = smov 15  }
  0x3b   :  { %2237 = vmatprep.subr.bf16.mxu1 %v2236_v11  ;;  %v660_v24 = vmax.f32 %v2704_v23, %v2702_v22  ;;  %v448_v25 = vmax.f32 %v2700_v21, %v2696_v20  ;;  %v2717_v27 = vld [vmem:[#allocation6 + $0x10] sm:$0xff]  ;;  %v2719_v28 = vld [vmem:[#allocation6 + $0x28] sm:$0xff]  ;;  %v2721_v29 = vld [vmem:[#allocation6 + $0x20] sm:$0xff]  ;;  %v2256_v37 = vpack.c.bf16 %v2713_v26, %v2696_v20  ;;  %s2567_s30 = smov 1   ;;  %vm1038_vm5 = vcmask 7168   ;;  %s3072_s9 = sld [smem:[#allocation8 + $0x9]] }
  0x3c   :  { %2219 = vmatpush3.bf16.msra.mxu0 %v2557_v3  ;;  %v454_v30 = vmax.f32 %v2721_v29, %v2719_v28  ;;  %v451_v31 = vmax.f32 %v2717_v27, %v2713_v26  ;;  %v2731_v32 = vld [vmem:[#allocation6 + $0x58] sm:$0xff]  ;;  %v2733_v33 = vld [vmem:[#allocation6 + $0x50] sm:$0xff]  ;;  %v2741_v36 = vld [vmem:[#allocation2 + $0x68] sm:$0xff]  ;;  %v2258_v44 = vpack.c.bf16 %v2717_v27, %v2700_v21  ;;  %vm1044_vm6 = vcmask 15360   ;;  %s3084_s12 = sld [smem:[#allocation8]]  ;;  %s3088_s13 = sld [smem:[#allocation8 + $0xa]] }
  0x3d   :  { %2220 = vmatprep.subr.bf16.mxu0 %v2557_v3  ;;  %449 = vmax.xlane.f32.xlu1 %v448_v25  ;;  %v872_v34 = vmax.f32 %v2733_v33, %v2731_v32  ;;  %v2747_v38 = vld [vmem:[#allocation2 + $0x60] sm:$0xff]  ;;  %v2749_v39 = vld [vmem:[#allocation2 + $0x78] sm:$0xff]  ;;  %v2751_v40 = vld [vmem:[#allocation2 + $0x70] sm:$0xff]  ;;  %v2280_v55 = vpack.c.bf16 %v2741_v36, %v2702_v22  ;;  %vm1050_vm7 = vcmask 23552   ;;  %vm1056_vm8 = vcmask 31744   ;;  %s3103_s14 = sld [smem:[#allocation8 + $0x1]] }
  0x3e   :  { %2239 = vmatpush1.bf16.msra.mxu1 %v2238_v14  ;;  %237 = vmax.xlane.f32.xlu0 %v236_v15  ;;  %v666_v41 = vmax.f32 %v2751_v40, %v2749_v39  ;;  %v663_v42 = vmax.f32 %v2747_v38, %v2741_v36  ;;  %v2757_v43 = vld [vmem:[#allocation6 + $0x38] sm:$0xff]  ;;  %v2766_v46 = vld [vmem:[#allocation6 + $0x30] sm:$0xff]  ;;  %v2778_v50 = vld [vmem:[#allocation6 + $0x68] sm:$0xff]  ;;  %v2282_v59 = vpack.c.bf16 %v2747_v38, %v2704_v23  ;;  %vm1062_vm9 = vcmask 39936   ;;  %s3113_s15 = sld [smem:[#allocation8 + $0x2]]  ;;  %s2568_s24 = smov 127  }
  0x3f   :  { %260 = vmatprep.subr.mxu1 %v2680_v16  ;;  %v2260_v45 = vpack.c.bf16 %v2757_v43, %v2719_v28  ;;  %v457_v48 = vmax.f32 %v2766_v46, %v2757_v43  ;;  %v2262_v49 = vpack.c.bf16 %v2766_v46, %v2721_v29  ;;  %v2780_v51 = vld [vmem:[#allocation6 + $0x60] sm:$0xff]  ;;  %v2783_v52 = vld [vmem:[#allocation6 + $0x48] sm:$0xff]  ;;  %v2830_v62 = vld [vmem:[#allocation2 + $0x98] sm:$0xff]  ;;  %v2304_v4 = vpack.c.bf16 %v2778_v50, %v2731_v32  ;;  %s2571_s25 = smov 112   ;;  %s3228_s10 = sld [smem:[#allocation8 + $0x6]] }
  0x40   :  { %2221 = vmatpush3.bf16.msra.mxu0 %v2557_v3  ;;  %v875_v53 = vmax.f32 %v2780_v51, %v2778_v50  ;;  %v2791_v54 = vld [vmem:[#allocation6 + $0x40] sm:$0xff]  ;;  %v2800_v56 = vld [vmem:[#allocation2 + $0x88] sm:$0xff]  ;;  %v2837_v63 = vld [vmem:[#allocation2 + $0x90] sm:$0xff]  ;;  %v2306_v11 = vpack.c.bf16 %v2780_v51, %v2733_v33  ;;  %vm1068_vm10 = vcmask 48128   ;;  %vm1074_vm11 = vcmask 56320   ;;  %s3230_s11 = sld [smem:[#allocation8 + $0xf]] }
  0x41   :  { %2222 = vmatprep.subr.bf16.mxu0 %v2557_v3  ;;  %452 = vmax.xlane.f32.xlu1 %v451_v31  ;;  %v2802_v57 = vld [vmem:[#allocation2 + $0x80] sm:$0xff]  ;;  %v2284_v60 = vpack.c.bf16 %v2800_v56, %v2749_v39  ;;  %v774_v9 = vld [vmem:[#allocation6 + $0x88] sm:$0xff]  ;;  %v772_v10 = vld [vmem:[#allocation6 + $0x78] sm:$0xff]  ;;  %v460_v25 = vmax.f32 %v2791_v54, %v2783_v52  ;;  %s2577_s17 = smov [#allocation10]  }
  0x42   :  { %261 = vmatpush1.msra.mxu1 %v2684_v17  ;;  %240 = vmax.xlane.f32.xlu0 %v239_v18  ;;  %v669_v58 = vmax.f32 %v2802_v57, %v2800_v56  ;;  %v2286_v61 = vpack.c.bf16 %v2802_v57, %v2751_v40  ;;  %v2881_v14 = vld [vmem:[#allocation6 + $0x80] sm:$0xff]  ;;  %v2308_v15 = vpack.c.bf16 %v774_v9, %v772_v10  ;;  %v2885_v18 = vld [vmem:[#allocation6 + $0x70] sm:$0xff]  ;;  %s1927_s18 = sshll.u32 %s2577_s17, 4  ;;  %s1928_s18 = int_to_ptr.vmem [resolvable:$true] %s1927_s18 }
  0x43   :  { %2240 = vmatprep.subr.bf16.mxu1 %v2557_v3  ;;  %1951 = vmatmul.mubr.msk.f32.vlgmr.msra.gmra.mrb[0].mxu1 %vm248_vm0, %v2559_v19  ;;  %v2895_v31 = vld [vmem:[#allocation6 + $0x90] sm:$0xff] }
  0x44   :  { %2223 = vmatpush3.bf16.msra.mxu0 %v2557_v3  ;;  %2241 = vmatpush3.bf16.msra.mxu1 %v2557_v3 }
  0x45   :  { %2224 = vmatprep.subr.bf16.mxu0 %v2557_v3  ;;  %2242 = vmatprep.subr.bf16.mxu1 %v2557_v3 }
  0x46   :  { %417 = vmatprep.mubr.f32.mxu1 %v2696_v20  ;;  %661 = vmax.xlane.f32.xlu0 %v660_v24  ;;  %v878_v24 = vmax.f32 %v2885_v18, %v772_v10 }
  0x47   :  { %243 = vmax.xlane.f32.xlu1 %v242_v35  ;;  %v672_v35 = vmax.f32 %v2837_v63, %v2830_v62 }
  0x48   :  { %2225 = vmatpush3.bf16.msra.mxu0 %v2557_v3  ;;  %2243 = vmatpush3.bf16.msra.mxu1 %v2557_v3 }
  0x49   :  { %2226 = vmatprep.subr.bf16.mxu0 %v2557_v3  ;;  %2244 = vmatprep.subr.bf16.mxu1 %v2557_v3 }
  0x4a   :  { %455 = vmax.xlane.f32.xlu0 %v454_v30  ;;  %v776_v30 = vld [vmem:[#allocation6 + $0x98] sm:$0xff] }
  0x4b   :  { %664 = vmax.xlane.f32.xlu1 %v663_v42  ;;  %v544_v42 = vmax.f32 %v2696_v20, %v2719_v28 }
  0x4c   :  { %2227 = vmatpush3.bf16.msra.mxu0 %v2557_v3  ;;  %2245 = vmatpush3.bf16.msra.mxu1 %v2557_v3 }
  0x4d   :  { %2228 = vmatprep.subr.bf16.mxu0 %v2557_v3  ;;  %2246 = vmatprep.subr.bf16.mxu1 %v2557_v3 }
  0x4e   :  { %873 = vmax.xlane.f32.xlu0 %v872_v34  ;;  %v881_v34 = vmax.f32 %v2881_v14, %v774_v9 }
  0x4f   :  { %458 = vmax.xlane.f32.xlu1 %v457_v48  ;;  %v546_v48 = vmax.f32 %v544_v42, %v2783_v52 }
  0x50   :  { %2229 = vmatpush3.bf16.msra.mxu0 %v2557_v3  ;;  %2247 = vmatpush3.bf16.msra.mxu1 %v2557_v3 }
  0x51   :  { %2230 = vmatprep.subr.bf16.mxu0 %v2557_v3  ;;  %2248 = vmatprep.subr.bf16.mxu1 %v2557_v3 }
  0x52   :  { %667 = vmax.xlane.f32.xlu0 %v666_v41  ;;  %v333_v41 = vmax.f32 %v2646_v0, %v2657_v6  ;;  %v757_v0 = vmax.f32 %v2741_v36, %v2800_v56 }
  0x53   :  { %876 = vmax.xlane.f32.xlu1 %v875_v53 }
  0x54   :  { %2231 = vmatpush3.bf16.msra.mxu0 %v2557_v3  ;;  %2249 = vmatpush3.bf16.msra.mxu1 %v2557_v3 }
  0x55   :  { %2250 = vmatprep.subr.bf16.mxu1 %v2557_v3  ;;  %2257 = vmatprep.subr.bf16.mxu0 %v2256_v37  ;;  %v884_v37 = vmax.f32 %v2895_v31, %v776_v30 }
  0x56   :  { %246 = vmax.xlane.f32.xlu0 %v245_v47  ;;  %v545_v47 = vmax.f32 %v2713_v26, %v2757_v43 }
  0x57   :  { %203 = vmatmul.mubr.f32.vlgmr.msra.gmra.mrb[0].mxu0 %v2650_v2  ;;  %670 = vmax.xlane.f32.xlu1 %v669_v58 }
  0x58   :  { %2251 = vmatpush3.bf16.msra.mxu1 %v2557_v3  ;;  %207 = vmatprep.mubr.f32.mxu0 %v2648_v1 }
  0x59   :  { %2252 = vmatprep.subr.bf16.mxu1 %v2557_v3  ;;  %2259 = vmatpush1.bf16.msra.mxu0 %v2258_v44  ;;  %v756_v44 = vmax.f32 %v2702_v22, %v2749_v39 }
  0x5a   :  { %2261 = vmatprep.subr.bf16.mxu0 %v2260_v45  ;;  %882 = vmax.xlane.f32.xlu0 %v881_v34  ;;  %v335_v45 = vmax.f32 %v333_v41, %v2680_v16 }
  0x5b   :  { %208 = vmatmul.mubr.f32.gmra.mrb[2].mxu0 %v2655_v5  ;;  %879 = vmax.xlane.f32.xlu1 %v878_v24 }
  0x5c   :  { %2253 = vmatpush3.bf16.msra.mxu1 %v2557_v3  ;;  %212 = vmatprep.mubr.f32.mxu0 %v2657_v6  ;;  %v758_v6 = vmax.f32 %v756_v44, %v2830_v62 }
  0x5d   :  { %2254 = vmatprep.subr.bf16.mxu1 %v2557_v3  ;;  %2263 = vmatpush1.bf16.msra.mxu0 %v2262_v49  ;;  %v968_v49 = vmax.f32 %v2731_v32, %v772_v10 }
  0x5e   :  { %471 = vmatprep.subr.mxu0 %v2783_v52  ;;  %673 = vmax.xlane.f32.xlu0 %v672_v35 }
  0x5f   :  { %213 = vmatmul.mubr.f32.gmra.mrb[4].mxu0 %v2669_v12  ;;  %461 = vmax.xlane.f32.xlu1 %v460_v25 }
  0x60   :  { %2255 = vmatpush3.bf16.msra.mxu1 %v2557_v3  ;;  %217 = vmatprep.mubr.f32.mxu0 %v2659_v7 }
  0x61   :  { %2264 = vmatprep.subr.bf16.mxu1 %v2557_v3  ;;  %472 = vmatpush1.msra.mxu0 %v2791_v54 }
  0x62   :  { %2281 = vmatprep.subr.bf16.mxu0 %v2280_v55  ;;  %885 = vmax.xlane.f32.xlu0 %v884_v37 }
  0x63   :  { %218 = vmatmul.mubr.f32.gmra.mrb[6].mxu0 %v2671_v13  ;;  %418 = vmatmul.mubr.f32.vlgmr.msra.gmra.mrb[2].mxu1 %v2700_v21 }
  0x64   :  { %2265 = vmatpush3.bf16.msra.mxu1 %v2557_v3  ;;  %222 = vmatprep.mubr.f32.mxu0 %v2680_v16 }
  0x65   :  { %422 = vmatprep.mubr.f32.mxu1 %v2713_v26  ;;  %2266 = vmatprep.subr.bf16.mxu1 %v2557_v3 }
  0x67   :  { %223 = vmatmul.mubr.f32.gmra.mrb[8].mxu0 %v2684_v17  ;;  %423 = vmatmul.mubr.f32.gmra.mrb[4].mxu1 %v2717_v27 }
  0x68   :  { %2267 = vmatpush3.bf16.msra.mxu1 %v2557_v3  ;;  %427 = vmatprep.mubr.f32.mxu1 %v2719_v28  ;;  %v547_v28 = vmax.f32 %v546_v48, %v545_v47 }
  0x69   :  { %527 = vmatprep.mubr.f32.mxu0 %v2558_v8  ;;  %2268 = vmatprep.subr.bf16.mxu1 %v2557_v3 }
  0x6a   :  { %v548_v16 = vrot.slane %v547_v28, 4 }
  0x6b   :  { %428 = vmatmul.mubr.f32.gmra.mrb[6].mxu1 %v2721_v29  ;;  %1952 = vmatmul.mubr.msk.f32.vlgmr.msra.gmra.mrb[10].mxu0 %vm248_vm0, %v2559_v19 }
  0x6c   :  { %2283 = vmatpush1.bf16.msra.mxu0 %v2282_v59  ;;  %2269 = vmatpush3.bf16.msra.mxu1 %v2557_v3 }
  0x6d   :  { %432 = vmatprep.mubr.f32.mxu1 %v2757_v43  ;;  %2285 = vmatprep.subr.bf16.mxu0 %v2284_v60  ;;  %v549_v43 = vmax.f32 %v547_v28, %v548_v16 }
  0x6e   :  { %2270 = vmatprep.subr.bf16.mxu1 %v2557_v3  ;;  %739 = vmatprep.mubr.f32.mxu0 %v2558_v8 }
  0x6f   :  { %433 = vmatmul.mubr.f32.gmra.mrb[8].mxu1 %v2766_v46  ;;  %v550_v59 = vrot.slane %v549_v43, 2 }
  0x70   :  { %2287 = vmatpush1.bf16.msra.mxu0 %v2286_v61  ;;  %2271 = vmatpush3.bf16.msra.mxu1 %v2557_v3 }
  0x71   :  { %683 = vmatprep.subr.mxu0 %v2830_v62  ;;  %2272 = vmatprep.subr.bf16.mxu1 %v2557_v3  ;;  %v551_v61 = vmax.f32 %v549_v43, %v550_v59 }
  0x72   :  { %437 = vmatprep.mubr.f32.mxu1 %v2783_v52 }
  0x73   :  { %438 = vmatmul.mubr.f32.gmra.mrb[10].mxu1 %v2791_v54 }
  0x74   :  { %684 = vmatpush1.msra.mxu0 %v2837_v63  ;;  %2273 = vmatpush3.bf16.msra.mxu1 %v2557_v3 }
  0x75   :  { %1953 = vmatmul.mubr.msk.f32.vlgmr.msra.gmra.mrb[12].mxu0 %vm248_vm0, %v2559_v19  ;;  %2288 = vmatprep.subr.bf16.mxu0 %v2557_v3 }
  0x76   :  { %2289 = vmatpush3.bf16.msra.mxu0 %v2557_v3  ;;  %2274 = vmatprep.subr.bf16.mxu1 %v2557_v3 }
  0x77   :  { %2290 = vmatprep.subr.bf16.mxu0 %v2557_v3  ;;  %629 = vmatprep.mubr.f32.mxu1 %v2702_v22  ;;  %v969_v22 = vmax.f32 %v2778_v50, %v774_v9 }
  0x78   :  { %2275 = vmatpush3.bf16.msra.mxu1 %v2557_v3  ;;  %841 = vmatprep.mubr.f32.mxu0 %v2731_v32 }
  0x79   :  { %2276 = vmatprep.subr.bf16.mxu1 %v2557_v3 }
  0x7a   :  { %2291 = vmatpush3.bf16.msra.mxu0 %v2557_v3 }
  0x7b   :  { %2292 = vmatprep.subr.bf16.mxu0 %v2557_v3 }
  0x7c   :  { %2277 = vmatpush3.bf16.msra.mxu1 %v2557_v3 }
  0x7d   :  { %2278 = vmatprep.subr.bf16.mxu1 %v2557_v3 }
  0x7e   :  { %2293 = vmatpush3.bf16.msra.mxu0 %v2557_v3 }
  0x7f   :  { %2294 = vmatprep.subr.bf16.mxu0 %v2557_v3 }
  0x80   :  { %2279 = vmatpush3.bf16.msra.mxu1 %v2557_v3 }
  0x82   :  { %2295 = vmatpush3.bf16.msra.mxu0 %v2557_v3 }
  0x83   :  { %630 = vmatmul.mubr.f32.vlgmr.msra.gmra.mrb[12].mxu1 %v2704_v23  ;;  %2296 = vmatprep.subr.bf16.mxu0 %v2557_v3 }
  0x84   :  { %634 = vmatprep.mubr.f32.mxu1 %v2741_v36 }
  0x86   :  { %2297 = vmatpush3.bf16.msra.mxu0 %v2557_v3 }
  0x87   :  { %635 = vmatmul.mubr.f32.gmra.mrb[14].mxu1 %v2747_v38  ;;  %2298 = vmatprep.subr.bf16.mxu0 %v2557_v3 }
  0x88   :  { %639 = vmatprep.mubr.f32.mxu1 %v2749_v39  ;;  %v970_v39 = vmax.f32 %v968_v49, %v776_v30 }
  0x8a   :  { %2299 = vmatpush3.bf16.msra.mxu0 %v2557_v3  ;;  %v971_v53 = vmax.f32 %v970_v39, %v969_v22 }
  0x8b   :  { %640 = vmatmul.mubr.f32.gmra.mrb[16].mxu1 %v2751_v40  ;;  %2300 = vmatprep.subr.bf16.mxu0 %v2557_v3 }
  0x8c   :  { %644 = vmatprep.mubr.f32.mxu1 %v2800_v56  ;;  %v972_v52 = vrot.slane %v971_v53, 4 }
  0x8e   :  { %2301 = vmatpush3.bf16.msra.mxu0 %v2557_v3  ;;  %v973_v60 = vmax.f32 %v971_v53, %v972_v52 }
  0x8f   :  { %645 = vmatmul.mubr.f32.gmra.mrb[18].mxu1 %v2802_v57  ;;  %2302 = vmatprep.subr.bf16.mxu0 %v2557_v3 }
  0x90   :  { %649 = vmatprep.mubr.f32.mxu1 %v2830_v62  ;;  %v974_v62 = vrot.slane %v973_v60, 2 }
  0x92   :  { %2303 = vmatpush3.bf16.msra.mxu0 %v2557_v3  ;;  %v2310_v3 = vpack.c.bf16 %v2881_v14, %v2885_v18 }
  0x93   :  { %2305 = vmatprep.subr.bf16.mxu0 %v2304_v4  ;;  %650 = vmatmul.mubr.f32.gmra.mrb[20].mxu1 %v2837_v63 }
  0x94   :  { %2196 = vmatprep.mubr.msk.f32.mxu1 %vm2564_vm4, %v2558_v8 }
  0x95   :  { %842 = vmatmul.mubr.f32.vlgmr.msra.gmra.mrb[14].mxu0 %v2733_v33 }
  0x96   :  { %846 = vmatprep.mubr.f32.mxu0 %v2778_v50  ;;  %2307 = vmatpush1.bf16.msra.mxu0 %v2306_v11  ;;  %v552_v50 = vrot.slane %v551_v61, 1 }
  0x97   :  { %2309 = vmatprep.subr.bf16.mxu0 %v2308_v15 }
  0x99   :  { %847 = vmatmul.mubr.f32.gmra.mrb[16].mxu0 %v2780_v51 }
  0x9a   :  { %851 = vmatprep.mubr.f32.mxu0 %v772_v10  ;;  %2311 = vmatpush1.bf16.msra.mxu0 %v2310_v3  ;;  %v553_v3 = vmax.f32 %v551_v61, %v552_v50 }
  0x9b   :  { %895 = vmatprep.subr.mxu0 %v776_v30 }
  0x9d   :  { %852 = vmatmul.mubr.f32.gmra.mrb[18].mxu0 %v2885_v18 }
  0x9e   :  { %856 = vmatprep.mubr.f32.mxu0 %v774_v9  ;;  %896 = vmatpush1.msra.mxu0 %v2895_v31  ;;  %v975_v9 = vmax.f32 %v973_v60, %v974_v62 }
  0xa0   :  { %v976_v24 = vrot.slane %v975_v9, 1 }
  0xa1   :  { %857 = vmatmul.mubr.f32.gmra.mrb[20].mxu0 %v2881_v14 }
  0xa2   :  { %861 = vmatprep.mubr.f32.mxu0 %v776_v30  ;;  %v977_v34 = vmax.f32 %v975_v9, %v976_v24 }
  0xa5   :  { %862 = vmatmul.mubr.f32.gmra.mrb[22].mxu0 %v2895_v31 }
  0xa6   :  { %951 = vmatprep.mubr.f32.mxu0 %v2558_v8 }
  0xa9   :  { %1954 = vmatmul.mubr.msk.f32.vlgmr.msra.gmra.mrb[24].mxu0 %vm248_vm0, %v2559_v19  ;;  %v334_v19 = vmax.f32 %v2648_v1, %v2659_v7  ;;  %v759_v1 = vmax.f32 %v758_v6, %v757_v0 }
  0xab   :  { %v336_v20 = vmax.f32 %v335_v45, %v334_v19  ;;  %v760_v55 = vrot.slane %v759_v1, 4 }
  0xad   :  { %v337_v7 = vrot.slane %v336_v20, 4  ;;  %v761_v58 = vmax.f32 %v759_v1, %v760_v55 }
  0xaf   :  { %v338_v26 = vmax.f32 %v336_v20, %v337_v7  ;;  %v762_v36 = vrot.slane %v761_v58, 2 }
  0xb1   :  { %v339_v32 = vrot.slane %v338_v26, 2  ;;  %v763_v4 = vmax.f32 %v761_v58, %v762_v36 }
  0xb3   :  { %v340_v56 = vmax.f32 %v338_v26, %v339_v32  ;;  %v764_v11 = vrot.slane %v763_v4, 1 }
  0xb5   :  { %v341_v10 = vrot.slane %v340_v56, 1  ;;  %v765_v25 = vmax.f32 %v763_v4, %v764_v11 }
  0xb7   :  { %v342_v15 = vmax.f32 %v340_v56, %v341_v10 }
  0xb9   :  { %v1291_v30 = vsel %vm1281_vm1, %v342_v15, %v553_v3 }
  0xba   :  { %v1293_v35 = vsel %vm1284_vm2, %v1291_v30, %v765_v25 }
  0xbb   :  { %v2927_v37 = vsel %vm1287_vm3, %v1293_v35, %v977_v34 }
 0x116   :  { %v318_v41 = vpop.f32.mrb[0].mxu1 }
 0x117   :  { %v320_v42 = vpop.f32.mrb[1].mxu1 }
 0x12a   :  { %v2018_v44 = vpop.f32.mrb[0].mxu0 }
 0x12b   :  { %v2019_v19 = vpop.f32.mrb[1].mxu0 }
 0x12c   :  { %v2929_v45 = vadd.f32 %v2019_v19, %v2018_v44 }
 0x12e   :  { %v2021_v47 = vpop.f32.mrb[2].mxu0 }
 0x12f   :  { %v2022_v48 = vpop.f32.mrb[3].mxu0 }
 0x130   :  { %v2931_v49 = vadd.f32 %v2022_v48, %v2021_v47 }
 0x132   :  { %v2024_v0 = vpop.f32.mrb[4].mxu0 }
 0x133   :  { %v2025_v6 = vpop.f32.mrb[5].mxu0 }
 0x134   :  { %v2933_v20 = vadd.f32 %v2025_v6, %v2024_v0 }
 0x136   :  { %v2027_v28 = vpop.f32.mrb[6].mxu0  ;;  %v2065_v22 = vpop.f32.mrb[2].mxu1 }
 0x137   :  { %v2028_v39 = vpop.f32.mrb[7].mxu0  ;;  %v2066_v1 = vpop.f32.mrb[3].mxu1 }
 0x138   :  { %v2935_v7 = vadd.f32 %v2028_v39, %v2027_v28  ;;  %v2067_v16 = vadd.f32 %v2066_v1, %v2065_v22  ;;  %v323_v22 = vmax.f32 %v2650_v2, %v2669_v12  ;;  %v534_v39 = vmax.f32 %v2700_v21, %v2721_v29 }
 0x139   :  { %v958_v21 = vmax.f32 %v2733_v33, %v2885_v18 }
 0x13a   :  { %v2030_v53 = vpop.f32.mrb[8].mxu0  ;;  %v2068_v55 = vpop.f32.mrb[4].mxu1  ;;  %v443_v52 = vmul.f32 0.00390625, %v2067_v16 }
 0x13b   :  { %v2031_v26 = vpop.f32.mrb[9].mxu0  ;;  %v2069_v43 = vpop.f32.mrb[5].mxu1 }
 0x13c   :  { %v2937_v58 = vadd.f32 %v2031_v26, %v2030_v53  ;;  %v2070_v32 = vadd.f32 %v2069_v43, %v2068_v55  ;;  %v746_v53 = vmax.f32 %v2704_v23, %v2751_v40  ;;  %v324_v26 = vmax.f32 %v2655_v5, %v2671_v13 }
 0x13d   :  { %v325_v43 = vmax.f32 %v323_v22, %v2684_v17  ;;  %v747_v23 = vmax.f32 %v2747_v38, %v2802_v57 }
 0x13e   :  { %v444_v59 = vmul.f32 0.00390625, %v2070_v32  ;;  %v529_v60 = vpop.f32.mrb[10].mxu0  ;;  %v2071_v36 = vpop.f32.mrb[6].mxu1  ;;  %v536_v32 = vmax.f32 %v534_v39, %v2791_v54  ;;  %v748_v29 = vmax.f32 %v746_v53, %v2837_v63  ;;  %v960_v54 = vmax.f32 %v958_v21, %v2895_v31 }
 0x13f   :  { %v1265_v56 = vrot.slane %v529_v60, 7  ;;  %v531_v61 = vpop.f32.mrb[11].mxu0  ;;  %v2072_v62 = vpop.f32.mrb[7].mxu1  ;;  %v326_v13 = vmax.f32 %v325_v43, %v324_v26 }
 0x140   :  { %v2344_v4 = vpack.i.bf16 %v444_v59, %v443_v52  ;;  %v1266_v10 = vrot.slane %v531_v61, 7  ;;  %v2073_v50 = vadd.f32 %v2072_v62, %v2071_v36  ;;  %v535_v52 = vmax.f32 %v2717_v27, %v2766_v46 }
 0x141   :  { %v1282_v9 = vsel %vm1281_vm1, %v318_v41, %v1265_v56  ;;  %v959_v46 = vmax.f32 %v2780_v51, %v2881_v14  ;;  %v749_v56 = vmax.f32 %v748_v29, %v747_v23  ;;  %v327_v33 = vrot.slane %v326_v13, 4 }
 0x142   :  { %v1283_v11 = vsel %vm1281_vm1, %v320_v42, %v1266_v10  ;;  %v2074_v15 = vpop.f32.mrb[8].mxu1  ;;  %2345 = vrot.lane.b32.xlu1 %v2344_v4, %s2560_s1  ;;  %v445_v24 = vmul.f32 0.00390625, %v2073_v50  ;;  %v537_v17 = vmax.f32 %v536_v32, %v535_v52 }
 0x143   :  { %v2075_v3 = vpop.f32.mrb[9].mxu1  ;;  %v961_v4 = vmax.f32 %v960_v54, %v959_v46  ;;  %v750_v10 = vrot.slane %v749_v56, 4  ;;  %v328_v51 = vmax.f32 %v326_v13, %v327_v33 }
 0x144   :  { %v2076_v25 = vadd.f32 %v2075_v3, %v2074_v15  ;;  %v538_v38 = vrot.slane %v537_v17, 4 }
 0x146   :  { %v446_v30 = vmul.f32 0.00390625, %v2076_v25  ;;  %v2077_v34 = vpop.f32.mrb[10].mxu1  ;;  %v539_v14 = vmax.f32 %v537_v17, %v538_v38 }
 0x147   :  { %v2078_v35 = vpop.f32.mrb[11].mxu1 }
 0x148   :  { %v2354_v44 = vpack.i.bf16 %v446_v30, %v445_v24  ;;  %v741_v19 = vpop.f32.mrb[12].mxu0  ;;  %v2079_v47 = vadd.f32 %v2078_v35, %v2077_v34  ;;  %v962_v24 = vrot.slane %v961_v4, 4  ;;  %v751_v30 = vmax.f32 %v749_v56, %v750_v10 }
 0x149   :  { %v1271_v48 = vrot.slane %v741_v19, 6  ;;  %v743_v0 = vpop.f32.mrb[13].mxu0  ;;  %v2562_v35 = vmov 0.0|0.0   ;;  %v540_v19 = vrot.slane %v539_v14, 2 }
 0x14a   :  { %v1272_v6 = vrot.slane %v743_v0, 6  ;;  %2355 = vrot.lane.b32.xlu1 %v2354_v44, %s2560_s1  ;;  %v447_v63 = vmul.f32 0.00390625, %v2079_v47  ;;  %2312 = vmatprep.subr.bf16.mxu1 %v2562_v35  ;;  %v329_v44 = vrot.slane %v328_v51, 2 }
 0x14b   :  { %v2944_v41 = vsel %vm1284_vm2, %v1282_v9, %v1271_v48  ;;  %v963_v48 = vmax.f32 %v961_v4, %v962_v24  ;;  %v541_v39 = vmax.f32 %v539_v14, %v540_v19 }
 0x14c   :  { %v2947_v42 = vsel %vm1284_vm2, %v1283_v11, %v1272_v6  ;;  %v752_v6 = vrot.slane %v751_v30, 2  ;;  %v330_v22 = vmax.f32 %v328_v51, %v329_v44 }
 0x14e   :  { %v753_v43 = vmax.f32 %v751_v30, %v752_v6 }
 0x150   :  { %v754_v29 = vrot.slane %v753_v43, 1 }
 0x152   :  { %v755_v54 = vmax.f32 %v753_v43, %v754_v29 }
 0x156   :  { %v2112_v28 = vpop.f32.mrb[12].mxu1 }
 0x157   :  { %v2113_v1 = vpop.f32.mrb[13].mxu1 }
 0x158   :  { %v2114_v16 = vadd.f32 %v2113_v1, %v2112_v28 }
 0x15a   :  { %v2115_v55 = vpop.f32.mrb[14].mxu1  ;;  %v655_v12 = vmul.f32 0.00390625, %v2114_v16 }
 0x15b   :  { %v2116_v2 = vpop.f32.mrb[15].mxu1 }
 0x15c   :  { %v2117_v59 = vadd.f32 %v2116_v2, %v2115_v55  ;;  %v964_v55 = vrot.slane %v963_v48, 2  ;;  %v331_v2 = vrot.slane %v330_v22, 1 }
 0x15e   :  { %v656_v40 = vmul.f32 0.00390625, %v2117_v59  ;;  %v2118_v5 = vpop.f32.mrb[16].mxu1  ;;  %v965_v21 = vmax.f32 %v963_v48, %v964_v55  ;;  %v229_v55 = vmul.f32 0.00390625, %v2931_v49 }
 0x15f   :  { %v2119_v60 = vpop.f32.mrb[17].mxu1 }
 0x160   :  { %v2349_v36 = vpack.i.bf16 %v656_v40, %v655_v12  ;;  %v2120_v27 = vadd.f32 %v2119_v60, %v2118_v5  ;;  %v542_v12 = vrot.slane %v541_v39, 1  ;;  %v332_v5 = vmax.f32 %v330_v22, %v331_v2 }
 0x162   :  { %v2121_v61 = vpop.f32.mrb[18].mxu1  ;;  %2350 = vrot.lane.b32.xlu0 %v2349_v36, %s2561_s26  ;;  %v657_v18 = vmul.f32 0.00390625, %v2120_v27  ;;  %v543_v13 = vmax.f32 %v541_v39, %v542_v12  ;;  %v966_v27 = vrot.slane %v965_v21, 1 }
 0x163   :  { %v2122_v57 = vpop.f32.mrb[19].mxu1 }
 0x164   :  { %v2123_v62 = vadd.f32 %v2122_v57, %v2121_v61  ;;  %v1290_v33 = vsel %vm1281_vm1, %v332_v5, %v543_v13 }
 0x165   :  { %v1292_v10 = vsel %vm1284_vm2, %v1290_v33, %v755_v54 }
 0x166   :  { %v658_v50 = vmul.f32 0.00390625, %v2123_v62  ;;  %991 = vrot.lane.b32.xlu0 %v447_v63, %s2560_s1  ;;  %v2124_v9 = vpop.f32.mrb[20].mxu1  ;;  %s2572_s1 = smov 111  }
 0x167   :  { %v2125_v31 = vpop.f32.mrb[21].mxu1 }
 0x168   :  { %v2359_v11 = vpack.i.bf16 %v658_v50, %v657_v18  ;;  %v2159_v15 = vpop.f32.mrb[14].mxu0  ;;  %v2126_v3 = vadd.f32 %v2125_v31, %v2124_v9  ;;  %v967_v18 = vmax.f32 %v965_v21, %v966_v27  ;;  %v450_v31 = vpop.xlane.xlu1 %449 }
 0x169   :  { %v2160_v25 = vpop.f32.mrb[15].mxu0 }
 0x16a   :  { %v2161_v34 = vadd.f32 %v2160_v25, %v2159_v15  ;;  %2360 = vrot.lane.b32.xlu1 %v2359_v11, %s2561_s26  ;;  %v659_v57 = vmul.f32 0.00390625, %v2126_v3  ;;  %v2987_v14 = vsel %vm1287_vm3, %v1292_v10, %v967_v18  ;;  %v232_v10 = vmul.f32 0.00390625, %v2937_v58 }
 0x16c   :  { %v2162_v47 = vpop.f32.mrb[16].mxu0  ;;  %v867_v1 = vmul.f32 0.00390625, %v2161_v34  ;;  %v453_v15 = vpop.xlane.xlu1 %452 }
 0x16d   :  { %v2163_v0 = vpop.f32.mrb[17].mxu0 }
 0x16e   :  { %v2164_v28 = vadd.f32 %v2163_v0, %v2162_v47 }
 0x170   :  { %v868_v16 = vmul.f32 0.00390625, %v2164_v28  ;;  %v2165_v53 = vpop.f32.mrb[18].mxu0  ;;  %v244_v24 = vpop.xlane.xlu1 %243 }
 0x171   :  { %v2166_v26 = vpop.f32.mrb[19].mxu0 }
 0x172   :  { %v2364_v52 = vpack.i.bf16 %v868_v16, %v867_v1  ;;  %v2167_v32 = vadd.f32 %v2166_v26, %v2165_v53  ;;  %v228_v53 = vmul.f32 0.00390625, %v2929_v45  ;;  %v230_v45 = vmul.f32 0.00390625, %v2933_v20 }
 0x174   :  { %v2168_v59 = vpop.f32.mrb[20].mxu0  ;;  %2365 = vrot.lane.b32.xlu1 %v2364_v52, %s2563_s27  ;;  %v869_v17 = vmul.f32 0.00390625, %v2167_v32  ;;  %v665_v30 = vpop.xlane.xlu1 %664 }
 0x175   :  { %v2169_v23 = vpop.f32.mrb[21].mxu0 }
 0x176   :  { %v2170_v40 = vadd.f32 %v2169_v23, %v2168_v59 }
 0x178   :  { %v870_v60 = vmul.f32 0.00390625, %v2170_v40  ;;  %v2171_v36 = vpop.f32.mrb[22].mxu0  ;;  %v459_v44 = vpop.xlane.xlu1 %458  ;;  %v231_v40 = vmul.f32 0.00390625, %v2935_v7 }
 0x179   :  { %v2172_v46 = vpop.f32.mrb[23].mxu0 }
 0x17a   :  { %v2369_v56 = vpack.i.bf16 %v870_v60, %v869_v17  ;;  %v2173_v61 = vadd.f32 %v2172_v46, %v2171_v36  ;;  %v1042_v20 = vsel %vm1038_vm5, %v231_v40, %v244_v24 }
 0x17c   :  { %v871_v38 = vmul.f32 0.00390625, %v2173_v61  ;;  %v953_v63 = vpop.f32.mrb[24].mxu0  ;;  %2370 = vrot.lane.b32.xlu1 %v2369_v56, %s2563_s27  ;;  %v877_v47 = vpop.xlane.xlu1 %876 }
 0x17d   :  { %v1277_v62 = vrot.slane %v953_v63, 5  ;;  %v955_v4 = vpop.f32.mrb[25].mxu0 }
 0x17e   :  { %v1278_v50 = vrot.slane %v955_v4, 5  ;;  %1031 = vrot.lane.b32.xlu0 %v871_v38, %s2563_s27  ;;  %s1968_s27 = sld [smem:[#allocation8 + $0xc]] }
 0x17f   :  { %v2979_v9 = vsel %vm1287_vm3, %v2944_v41, %v1277_v62  ;;  %v235_v41 = vpop.xlane.xlu0 %234 }
 0x180   :  { %v2983_v51 = vsel %vm1287_vm3, %v2947_v42, %v1278_v50  ;;  %1011 = vrot.lane.b32.xlu1 %v659_v57, %s2561_s26  ;;  %v3009_v0 = vpop.xlane.xlu1 %670  ;;  %v1039_v2 = vsel %vm1038_vm5, %v228_v53, %v235_v41  ;;  %s1967_s26 = sld [smem:[#allocation8 + $0x3]] }
 0x182   :  { %1303 = vrot.lane.b32.xlu0 %v2987_v14, %s2565_s28 }
 0x183   :  { %v238_v42 = vpop.xlane.xlu0 %237 }
 0x184   :  { %1305 = vrot.lane.b32.xlu1 %v2927_v37, %s2565_s28  ;;  %v3013_v28 = vpop.xlane.xlu1 %879  ;;  %v1040_v12 = vsel %vm1038_vm5, %v229_v55, %v238_v42 }
 0x186   :  { %1332 = vrot.lane.b32.xlu0 %v2987_v14, %s2554_s8 }
 0x187   :  { %v241_v11 = vpop.xlane.xlu0 %240 }
 0x188   :  { %1334 = vrot.lane.b32.xlu1 %v2927_v37, %s2554_s8  ;;  %v3017_v39 = vpop.xlane.xlu1 %461  ;;  %v1041_v46 = vsel %vm1038_vm5, %v230_v45, %v241_v11 }
 0x18a   :  { %1361 = vrot.lane.b32.xlu0 %v2987_v14, %s2566_s29 }
 0x18b   :  { %v662_v3 = vpop.xlane.xlu0 %661 }
 0x18c   :  { %1363 = vrot.lane.b32.xlu1 %v2927_v37, %s2566_s29 }
 0x18e   :  { %1296 = vrot.lane.b32.xlu0 %v2979_v9, %s2565_s28 }
 0x18f   :  { %v456_v25 = vpop.xlane.xlu0 %455 }
 0x190   :  { %1298 = vrot.lane.b32.xlu1 %v2983_v51, %s2565_s28  ;;  %s1970_s28 = sld [smem:[#allocation8 + $0xd]] }
 0x192   :  { %1325 = vrot.lane.b32.xlu0 %v2979_v9, %s2554_s8 }
 0x193   :  { %v874_v34 = vpop.xlane.xlu0 %873 }
 0x194   :  { %1327 = vrot.lane.b32.xlu1 %v2983_v51, %s2554_s8 }
 0x196   :  { %1354 = vrot.lane.b32.xlu0 %v2979_v9, %s2566_s29 }
 0x197   :  { %v3007_v19 = vpop.xlane.xlu0 %667 }
 0x198   :  { %1356 = vrot.lane.b32.xlu1 %v2983_v51, %s2566_s29  ;;  %s1969_s29 = sld [smem:[#allocation8 + $0x4]] }
 0x19a   :  { %1383 = vrot.lane.b32.xlu0 %v2979_v9, %s2567_s30 }
 0x19b   :  { %v247_v48 = vpop.xlane.xlu0 %246 }
 0x19f   :  { %v3011_v6 = vpop.xlane.xlu0 %882 }
 0x1a3   :  { %v3015_v22 = vpop.xlane.xlu0 %673 }
 0x1a7   :  { %v3019_v1 = vpop.xlane.xlu0 %885 }
 0x1b4   :  { %v2346_v16 = vpop.permute.xlu1 %2345 }
 0x1b5   :  { %v2348_v26 = vunpack.i.h.bf16 %v2346_v16  ;;  %v2347_v43 = vunpack.i.l.bf16 %v2346_v16  ;;  %v1043_v16 = vsel %vm1038_vm5, %v232_v10, %v247_v48  ;;  %vm1169_vm5 = vcmask 1043456  }
 0x1b7   :  { %v1046_v59 = vsel %vm1044_vm6, %v1040_v12, %v2348_v26  ;;  %v1045_v21 = vsel %vm1044_vm6, %v1039_v2, %v2347_v43 }
 0x1b8   :  { %v1051_v17 = vsel %vm1050_vm7, %v1045_v21, %v450_v31  ;;  %v1052_v60 = vsel %vm1050_vm7, %v1046_v59, %v453_v15 }
 0x1bc   :  { %v2356_v52 = vpop.permute.xlu1 %2355 }
 0x1bd   :  { %v2358_v5 = vunpack.i.h.bf16 %v2356_v52  ;;  %v2357_v13 = vunpack.i.l.bf16 %v2356_v52 }
 0x1bf   :  { %v1048_v7 = vsel %vm1044_vm6, %v1042_v20, %v2358_v5  ;;  %v1047_v33 = vsel %vm1044_vm6, %v1041_v46, %v2357_v13  ;;  %v1313_v20 = vstv %s3084_s12  ;;  %s3232_s12 = sld [smem:[#allocation8 + $0x7]] }
 0x1c0   :  { %v1053_v11 = vsel %vm1050_vm7, %v1047_v33, %v456_v25  ;;  %v1054_v15 = vsel %vm1050_vm7, %v1048_v7, %v459_v44  ;;  %v1345_v33 = vstv %s3088_s13  ;;  %s3234_s13 = sld [smem:[#allocation8 + $0x10]] }
 0x1d4   :  { %v2351_v32 = vpop.permute.xlu0 %2350 }
 0x1d5   :  { %v2353_v23 = vunpack.i.h.bf16 %v2351_v32  ;;  %v2352_v29 = vunpack.i.l.bf16 %v2351_v32 }
 0x1d7   :  { %v1057_v36 = vsel %vm1056_vm8, %v1051_v17, %v2352_v29  ;;  %v1058_v27 = vsel %vm1056_vm8, %v1052_v60, %v2353_v23  ;;  %v1316_v60 = vstv %s3072_s9  ;;  %s3226_s9 = sld [smem:[#allocation8 + $0x5]] }
 0x1d8   :  { %v1063_v38 = vsel %vm1062_vm9, %v1057_v36, %v662_v3  ;;  %v1064_v57 = vsel %vm1062_vm9, %v1058_v27, %v665_v30  ;;  %v992_v31 = vpop.permute.xlu0 %991  ;;  %v71_v3 = vlaneseq }
 0x1d9   :  { %v1049_v58 = vsel %vm1044_vm6, %v1043_v16, %v992_v31 }
 0x1da   :  { %v3056_v26 = vand.u32 127, %v71_v3 }
 0x1dc   :  { %v2361_v49 = vpop.permute.xlu1 %2360  ;;  %vm1300_vm12 = vcmp.lt.s32.totalorder %v3056_v26, 17  ;;  %vm1329_vm13 = vcmp.lt.s32.totalorder %v3056_v26, 16  ;;  %vm1358_vm14 = vcmp.lt.s32.totalorder %v3056_v26, 15  ;;  %v3098_v5 = vadd.s32 128, %v3056_v26 }
 0x1dd   :  { %v2363_v63 = vunpack.i.h.bf16 %v2361_v49  ;;  %v2362_v18 = vunpack.i.l.bf16 %v2361_v49  ;;  %v74_v13 = vand.u32 15, %v3056_v26  ;;  %vm76_vm15 = vcmp.ge.s32.totalorder %v3056_v26, 16 }
 0x1de   :  { %vm1432_vm6 = vcmp.lt.s32.totalorder %v3056_v26, 127 }
 0x1df   :  { %v1059_v24 = vsel %vm1056_vm8, %v1053_v11, %v2362_v18  ;;  %v1060_v30 = vsel %vm1056_vm8, %v1054_v15, %v2363_v63  ;;  %vm116_vm2 = vcmp.lt.s32.totalorder %v74_v13, 15 }
 0x1e0   :  { %v1065_v25 = vsel %vm1062_vm9, %v1059_v24, %v3007_v19  ;;  %v1066_v44 = vsel %vm1062_vm9, %v1060_v30, %v3009_v0 }
 0x1e6   :  { %v2366_v54 = vpop.permute.xlu1 %2365 }
 0x1e7   :  { %v2368_v56 = vunpack.i.h.bf16 %v2366_v54  ;;  %v2367_v61 = vunpack.i.l.bf16 %v2366_v54  ;;  %v75_v54 = vand.u32 15, %v3098_v5 }
 0x1e9   :  { %v1069_v62 = vsel %vm1068_vm10, %v1063_v38, %v2367_v61  ;;  %v1070_v4 = vsel %vm1068_vm10, %v1064_v57, %v2368_v56  ;;  %v1945_v38 = vsel %vm76_vm15, 1.0, %v2558_v8  ;;  %vm83_vm1 = vcmp.ge.s32.totalorder %v75_v54, 1 }
 0x1ea   :  { %v1075_v50 = vsel %vm1074_vm11, %v1069_v62, %v874_v34  ;;  %v1076_v41 = vsel %vm1074_vm11, %v1070_v4, %v877_v47  ;;  %v3127_v30 = vsel %vm83_vm1, 1.0, %v2558_v8  ;;  %vm117_vm3 = vcmp.lt.s32.totalorder %v75_v54, 15  ;;  %v68_v54 = vld [vmem:[%s3410_s3 + $0x10] sm:$0xff] }
 0x1eb   :  { %v2313_v42 = vpack.c.bf16 %v1076_v41, %v1075_v50  ;;  %v1342_v41 = vstv %s3103_s14  ;;  %s3241_s14 = sld [smem:[#allocation8 + $0x11]] }
 0x1ed   :  { %2314 = vmatpush3.bf16.msra.mxu1 %v2313_v42 }
 0x1ee   :  { %v2371_v53 = vpop.permute.xlu1 %2370  ;;  %2315 = vmatprep.subr.bf16.mxu1 %v2562_v35  ;;  %v1055_v35 = vsel %vm1050_vm7, %v1049_v58, %v3017_v39  ;;  %vm113_vm7 = vcmp.lt.s32.totalorder %v3098_v5, 240  ;;  %v1474_v5 = vstv %s3228_s10 }
 0x1ef   :  { %v2373_v34 = vunpack.i.h.bf16 %v2371_v53  ;;  %v2372_v47 = vunpack.i.l.bf16 %v2371_v53 }
 0x1f0   :  { %v1032_v55 = vpop.permute.xlu0 %1031 }
 0x1f1   :  { %v1071_v43 = vsel %vm1068_vm10, %v1065_v25, %v2372_v47  ;;  %v1072_v48 = vsel %vm1068_vm10, %v1066_v44, %v2373_v34  ;;  %v3135_v25 = vsel %vm116_vm2, 1.0, %v2558_v8 }
 0x1f2   :  { %v1012_v52 = vpop.permute.xlu1 %1011  ;;  %v1077_v32 = vsel %vm1074_vm11, %v1071_v43, %v3013_v28  ;;  %v1078_v19 = vsel %vm1074_vm11, %v1072_v48, %v3011_v6 }
 0x1f3   :  { %v1061_v0 = vsel %vm1056_vm8, %v1055_v35, %v1012_v52  ;;  %v2316_v2 = vpack.c.bf16 %v1078_v19, %v1077_v32 }
 0x1f4   :  { %v1067_v12 = vsel %vm1062_vm9, %v1061_v0, %v3015_v22  ;;  %v1304_v59 = vpop.permute.xlu0 %1303  ;;  %v65_v22 = vld [vmem:[%s3409_s2] sm:$0xf]  ;;  %s3100_s2 = sld [smem:[#allocation8 + $0xb]]  ;;  %vm1490_vm9 = vcmp.lt.s32.totalorder %v3056_v26, 112 }
 0x1f5   :  { %2317 = vmatpush3.bf16.msra.mxu1 %v2316_v2  ;;  %v1073_v21 = vsel %vm1068_vm10, %v1067_v12, %v1032_v55  ;;  %v1371_v55 = vstv %s3113_s15  ;;  %vm1519_vm10 = vcmp.lt.s32.totalorder %v3056_v26, 111  ;;  %s2576_s15 = smov [#allocation9]  }
 0x1f6   :  { %v1306_v39 = vpop.permute.xlu1 %1305  ;;  %2194 = vmatprep.subr.mxu1 %v2558_v8  ;;  %v1079_v29 = vsel %vm1074_vm11, %v1073_v21, %v3019_v1  ;;  %s1915_s16 = sshll.u32 %s2576_s15, 4  ;;  %s1916_s16 = int_to_ptr.vmem [resolvable:$true] %s1915_s16 }
 0x1f7   :  { %v1307_v6 = vsel %vm1300_vm12, %v1304_v59, %v1306_v39  ;;  %v1308_v28 = vsel %vm1300_vm12, %v1306_v39, %v1304_v59  ;;  %v1367_v59 = vmul.f32 %v3135_v25, %v1945_v38  ;;  %s2498_s19 = scalar_lea.vmem %s1916_s16, 2560  ;;  %p2503_p8 = scmp.lt.s32.totalorder %s1916_s16, %s1916_s16 }
 0x1f8   :  { %v1333_v23 = vpop.permute.xlu0 %1332  ;;  %v1317_v56 = vmul.f32 %v1316_v60, %v1308_v28  ;;  %v1318_v61 = vmul.f32 %v1316_v60, %v1307_v6  ;;  %p2499_p7 = scmp.ne.s32.totalorder %s1916_s16, %s2498_s19  ;;  %p2504_p9 = scmp.lt.s32.totalorder %s2498_s19, %s2498_s19 }
 0x1f9   :  { %2195 = vmatpush3.msra.mxu1 %v1079_v29 }
 0x1fa   :  { %v1335_v45 = vpop.permute.xlu1 %1334  ;;  %2197 = vmatmul.mubr.msk.f32.vlgmr.msra.gmra.mrb[22].mxu1 %vm248_vm0, %v65_v22  ;;  %2199 = vmatprep.subr.mxu1 %v2558_v8  ;;  %vm82_vm0 = vcmp.ge.s32.totalorder %v74_v13, 1  ;;  %v1374_v50 = vstv %s3100_s2  ;;  %v3145_v22 = vsel %vm117_vm3, 1.0, %v2558_v8  ;;  %s3236_s2 = sld [smem:[#allocation8 + $0x8]]  ;;  %p2505_p10 = por %p2504_p9, %p2503_p8 }
 0x1fb   :  { %v1336_v49 = vsel %vm1329_vm13, %v1333_v23, %v1335_v45  ;;  %v1337_v1 = vsel %vm1329_vm13, %v1335_v45, %v1333_v23  ;;  %2201 = vmatprep.mubr.msk.f32.mxu1 %vm2564_vm4, %v2558_v8  ;;  %v3122_v18 = vsel %vm82_vm0, 1.0, %v2558_v8 }
 0x1fc   :  { %v1362_v40 = vpop.permute.xlu0 %1361  ;;  %v1346_v42 = vmul.f32 %v1345_v33, %v1337_v1  ;;  %v1347_v31 = vmul.f32 %v1345_v33, %v1336_v49  ;;  %v1309_v16 = vmul.f32 %v3122_v18, %v1945_v38  ;;  %p2506_p11 = pnand %p2505_p10, %p2499_p7 }
 0x1fe   :  { %v1364_v17 = vpop.permute.xlu1 %1363 }
 0x1ff   :  { %v1365_v36 = vsel %vm1358_vm14, %v1362_v40, %v1364_v17  ;;  %v1366_v27 = vsel %vm1358_vm14, %v1364_v17, %v1362_v40 }
 0x200   :  { %v1297_v46 = vpop.permute.xlu0 %1296  ;;  %v1375_v44 = vmul.f32 %v1374_v50, %v1366_v27  ;;  %v1376_v43 = vmul.f32 %v1374_v50, %v1365_v36  ;;  %v66_v36 = vld [vmem:[%s3410_s3] sm:$0xff] }
 0x202   :  { %v1299_v7 = vpop.permute.xlu1 %1298 }
 0x203   :  { %v1301_v57 = vsel %vm1300_vm12, %v1297_v46, %v1299_v7  ;;  %v1302_v63 = vsel %vm1300_vm12, %v1299_v7, %v1297_v46  ;;  %v67_v46 = vld [vmem:[%s3410_s3 + $0x8] sm:$0xff] }
 0x204   :  { %v1314_v62 = vmul.f32 %v1313_v20, %v1302_v63  ;;  %v1315_v4 = vmul.f32 %v1313_v20, %v1301_v57  ;;  %v1326_v10 = vpop.permute.xlu0 %1325  ;;  %v69_v20 = vld [vmem:[%s3410_s3 + $0x18] sm:$0xff] }
 0x206   :  { %v1319_v11 = vadd.f32 %v1317_v56, %v1314_v62  ;;  %v1320_v15 = vadd.f32 %v1318_v61, %v1315_v4  ;;  %v1328_v24 = vpop.permute.xlu1 %1327  ;;  %v70_v56 = vld [vmem:[%s3410_s3 + $0x20] sm:$0xff]  ;;  %s2570_s3 = smov 113  }
 0x207   :  { %v1330_v53 = vsel %vm1329_vm13, %v1326_v10, %v1328_v24  ;;  %v1331_v58 = vsel %vm1329_vm13, %v1328_v24, %v1326_v10  ;;  %v2569_v10 = vmov 2  }
 0x208   :  { %v1343_v34 = vmul.f32 %v1342_v41, %v1331_v58  ;;  %v1344_v47 = vmul.f32 %v1342_v41, %v1330_v53  ;;  %v1322_v48 = vmul.f32 %v3127_v30, %v1320_v15  ;;  %v1355_v32 = vpop.permute.xlu0 %1354  ;;  %v1321_v0 = vmul.f32 %v1319_v11, %v1309_v16  ;;  %2374 = vset.pattern.permute.xlu0 %v2569_v10 }
 0x209   :  { %2378 = vset.pattern.permute.xlu1 %v2569_v10 }
 0x20a   :  { %v1348_v35 = vadd.f32 %v1346_v42, %v1343_v34  ;;  %v1349_v52 = vadd.f32 %v1347_v31, %v1344_v47  ;;  %v1357_v19 = vpop.permute.xlu1 %1356 }
 0x20b   :  { %v1359_v2 = vsel %vm1358_vm14, %v1355_v32, %v1357_v19  ;;  %v1360_v12 = vsel %vm1358_vm14, %v1357_v19, %v1355_v32 }
 0x20c   :  { %v1350_v21 = vmul.f32 %v1945_v38, %v1348_v35  ;;  %v1353_v39 = vadd.f32 %v1349_v52, %v1322_v48  ;;  %v1372_v6 = vmul.f32 %v1371_v55, %v1360_v12  ;;  %v1373_v28 = vmul.f32 %v1371_v55, %v1359_v2  ;;  %v1384_v42 = vpop.permute.xlu0 %1383 }
 0x20d   :  { %v1400_v2 = vstv %s1967_s26 }
 0x20e   :  { %v1352_v23 = vadd.f32 %v1350_v21, %v1321_v0  ;;  %v1377_v29 = vadd.f32 %v1375_v44, %v1372_v6  ;;  %v1378_v45 = vadd.f32 %v1376_v43, %v1373_v28  ;;  %v1403_v21 = vstv %s1968_s27 }
 0x210   :  { %v1379_v49 = vmul.f32 %v1377_v29, %v1367_v59  ;;  %v1380_v1 = vmul.f32 %v3145_v22, %v1378_v45 }
 0x212   :  { %v3148_v40 = vadd.f32 %v1379_v49, %v1352_v23  ;;  %v3150_v13 = vadd.f32 %v1380_v1, %v1353_v39 }
 0x2cd   :  { %v1149_v17 = vpop.f32.mrb[22].mxu1 }
 0x2ce   :  { %v1153_v60 = vmax.f32 %v1149_v17, 0.0  ;;  %v2198_v27 = vpop.f32.mrb[23].mxu1 }
 0x2d0   :  { %2200 = vmatpush3.msk.msra.mxu1 %vm1169_vm5, %v1153_v60 }
 0x2d1   :  { %2202 = vmatmul.mubr.msk.f32.vlgmr.msra.gmra.mrb[24].mxu1 %vm1056_vm8, %v66_v36 }
 0x2d2   :  { %2204 = vmatprep.mubr.msk.f32.mxu1 %vm2564_vm4, %v2558_v8 }
 0x2d5   :  { %2205 = vmatmul.mubr.msk.f32.gmra.mrb[26].mxu1 %vm1056_vm8, %v67_v46 }
 0x2d6   :  { %2207 = vmatprep.mubr.msk.f32.mxu1 %vm2564_vm4, %v2558_v8 }
 0x2d9   :  { %2208 = vmatmul.mubr.msk.f32.gmra.mrb[28].mxu1 %vm1056_vm8, %v68_v54 }
 0x2da   :  { %2210 = vmatprep.mubr.msk.f32.mxu1 %vm2564_vm4, %v2558_v8 }
 0x2dd   :  { %2211 = vmatmul.mubr.msk.f32.gmra.mrb[30].mxu1 %vm1056_vm8, %v69_v20 }
 0x2de   :  { %2213 = vmatprep.mubr.msk.f32.mxu1 %vm2564_vm4, %v2558_v8  ;;  %vm1387_vm4 = vcmp.lt.s32.totalorder %v3056_v26, 1 }
 0x2e1   :  { %2214 = vmatmul.mubr.msk.f32.gmra.mrb[32].mxu1 %vm1056_vm8, %v70_v56  ;;  %vm1461_vm8 = vcmp.lt.s32.totalorder %v3056_v26, 113 }
 0x3a4   :  { %v1239_v61 = vpop.f32.mrb[24].mxu1 }
 0x3a5   :  { %1561 = vrot.lane.b32.xlu1 %v1239_v61, %s2568_s24  ;;  %v2203_v7 = vpop.f32.mrb[25].mxu1 }
 0x3a6   :  { %v2573_v7 = vmov 0  }
 0x3a8   :  { %v1244_v33 = vpop.f32.mrb[26].mxu1 }
 0x3a9   :  { %1563 = vrot.lane.b32.xlu0 %v1244_v33, %s2568_s24  ;;  %v2206_v38 = vpop.f32.mrb[27].mxu1 }
 0x3ac   :  { %v1249_v57 = vpop.f32.mrb[28].mxu1 }
 0x3ad   :  { %1565 = vrot.lane.b32.xlu1 %v1249_v57, %s2568_s24  ;;  %v2209_v63 = vpop.f32.mrb[29].mxu1 }
 0x3b0   :  { %v1254_v62 = vpop.f32.mrb[30].mxu1 }
 0x3b1   :  { %1567 = vrot.lane.b32.xlu0 %v1254_v62, %s2568_s24  ;;  %v2212_v4 = vpop.f32.mrb[31].mxu1 }
 0x3b4   :  { %v3182_v50 = vpop.f32.mrb[32].mxu1 }
 0x3b5   :  { %1390 = vrot.lane.b32.xlu0 %v2987_v14, %s2567_s30  ;;  %1569 = vrot.lane.b32.xlu1 %v3182_v50, %s2568_s24  ;;  %v2215_v41 = vpop.f32.mrb[33].mxu1 }
 0x3b9   :  { %1428 = vrot.lane.b32.xlu0 %v2979_v9, %s2568_s24  ;;  %1385 = vrot.lane.b32.xlu1 %v2983_v51, %s2567_s30 }
 0x3bd   :  { %1435 = vrot.lane.b32.xlu0 %v2987_v14, %s2568_s24  ;;  %1392 = vrot.lane.b32.xlu1 %v2927_v37, %s2567_s30  ;;  %s3224_s30 = sld [smem:[#allocation8 + $0xe]] }
 0x3c1   :  { %1457 = vrot.lane.b32.xlu0 %v2979_v9, %s2570_s3  ;;  %1430 = vrot.lane.b32.xlu1 %v2983_v51, %s2568_s24 }
 0x3c5   :  { %1464 = vrot.lane.b32.xlu0 %v2987_v14, %s2570_s3  ;;  %1437 = vrot.lane.b32.xlu1 %v2927_v37, %s2568_s24 }
 0x3c9   :  { %1486 = vrot.lane.b32.xlu0 %v2979_v9, %s2571_s25  ;;  %1459 = vrot.lane.b32.xlu1 %v2983_v51, %s2570_s3 }
 0x3cd   :  { %1493 = vrot.lane.b32.xlu0 %v2987_v14, %s2571_s25  ;;  %1466 = vrot.lane.b32.xlu1 %v2927_v37, %s2570_s3 }
 0x3d1   :  { %1515 = vrot.lane.b32.xlu0 %v2979_v9, %s2572_s1  ;;  %1488 = vrot.lane.b32.xlu1 %v2983_v51, %s2571_s25 }
 0x3d5   :  { %1495 = vrot.lane.b32.xlu1 %v2927_v37, %s2571_s25  ;;  %1522 = vrot.lane.b32.xlu0 %v2987_v14, %s2572_s1 }
 0x3d9   :  { %1517 = vrot.lane.b32.xlu1 %v2983_v51, %s2572_s1 }
 0x3dd   :  { %1524 = vrot.lane.b32.xlu1 %v2927_v37, %s2572_s1 }
 0x417   :  { %v1562_v31 = vpop.permute.xlu1 %1561 }
 0x418   :  { %v1576_v11 = vadd.f32 %v1562_v31, %v1239_v61 }
 0x41a   :  { %v1981_v15 = vmul.f32 -1.442695, %v1576_v11 }
 0x41b   :  { %v1564_v24 = vpop.permute.xlu0 %1563 }
 0x41c   :  { %2394 = vpow2.f32 %v1981_v15  ;;  %v1577_v16 = vadd.f32 %v1564_v24, %v1244_v33 }
 0x41e   :  { %v1982_v53 = vmul.f32 -1.442695, %v1577_v16 }
 0x41f   :  { %v1566_v58 = vpop.permute.xlu1 %1565 }
 0x420   :  { %2396 = vpow2.f32 %v1982_v53  ;;  %v1578_v48 = vadd.f32 %v1566_v58, %v1249_v57 }
 0x422   :  { %v1983_v0 = vmul.f32 -1.442695, %v1578_v48  ;;  %v1419_v48 = vstv %s1970_s28 }
 0x423   :  { %v1568_v34 = vpop.permute.xlu0 %1567 }
 0x424   :  { %v1579_v47 = vadd.f32 %v1568_v34, %v1254_v62  ;;  %v2574_v62 = vmov 6  }
 0x426   :  { %v2395_v44 = vpop.eup %2394  ;;  %v1984_v35 = vmul.f32 -1.442695, %v1579_v47 }
 0x427   :  { %v1596_v55 = vadd.f32 1.0, %v2395_v44  ;;  %v1570_v43 = vpop.permute.xlu1 %1569  ;;  %v1391_v39 = vpop.permute.xlu0 %1390 }
 0x428   :  { %v1580_v57 = vadd.f32 %v1570_v43, %v3182_v50 }
 0x429   :  { %2398 = vrcp.f32 %v1596_v55 }
 0x42a   :  { %v2397_v52 = vpop.eup %2396  ;;  %2400 = vpow2.f32 %v1984_v35  ;;  %v1416_v35 = vstv %s1969_s29 }
 0x42b   :  { %v1597_v32 = vadd.f32 1.0, %v2397_v52  ;;  %v1386_v19 = vpop.permute.xlu1 %1385  ;;  %v1429_v11 = vpop.permute.xlu0 %1428 }
 0x42c   :  { %v1388_v12 = vsel %vm1387_vm4, %v1384_v42, %v1386_v19  ;;  %v1389_v59 = vsel %vm1387_vm4, %v1386_v19, %v1384_v42  ;;  %v1417_v19 = vmul.f32 %v1416_v35, %v2979_v9 }
 0x42d   :  { %2402 = vrcp.f32 %v1597_v32  ;;  %v1401_v29 = vmul.f32 %v1400_v2, %v1389_v59  ;;  %v1402_v45 = vmul.f32 %v1400_v2, %v1388_v12  ;;  %v1420_v32 = vmul.f32 %v1419_v48, %v2987_v14 }
 0x42e   :  { %2404 = vpow2.f32 %v1983_v0  ;;  %v1421_v0 = vmul.f32 %v1419_v48, %v2927_v37  ;;  %v1448_v2 = vstv %s3224_s30  ;;  %v1948_v37 = vsel %vm113_vm7, 1.0, %v2558_v8 }
 0x42f   :  { %v1393_v6 = vpop.permute.xlu1 %1392  ;;  %v1436_v24 = vpop.permute.xlu0 %1435 }
 0x430   :  { %v1394_v28 = vsel %vm1387_vm4, %v1391_v39, %v1393_v6  ;;  %v1395_v23 = vsel %vm1387_vm4, %v1393_v6, %v1391_v39  ;;  %v1418_v39 = vmul.f32 %v1416_v35, %v2983_v51  ;;  %v1477_v6 = vstv %s3230_s11 }
 0x431   :  { %v1404_v49 = vmul.f32 %v1403_v21, %v1395_v23  ;;  %v1405_v1 = vmul.f32 %v1403_v21, %v1394_v28  ;;  %v1445_v21 = vstv %s3226_s9 }
 0x433   :  { %v2399_v17 = vpop.eup %2398  ;;  %v1406_v60 = vadd.f32 %v1404_v49, %v1401_v29  ;;  %v1407_v36 = vadd.f32 %v1405_v1, %v1402_v45  ;;  %v1431_v31 = vpop.permute.xlu1 %1430  ;;  %v1503_v49 = vstv %s3232_s12  ;;  %v1506_v1 = vstv %s3234_s13 }
 0x434   :  { %1613 = vperm.xlu0 %2374, %v2399_v17   ;;  %v2401_v54 = vpop.eup %2400  ;;  %v1458_v58 = vpop.permute.xlu0 %1457  ;;  %v1433_v9 = vsel %vm1432_vm6, %v1429_v11, %v1431_v31  ;;  %v1434_v28 = vsel %vm1432_vm6, %v1431_v31, %v1429_v11  ;;  %v1471_v11 = vmul.f32 %v1948_v37, %v3127_v30 }
 0x435   :  { %v1408_v27 = vmul.f32 %v3122_v18, %v1406_v60  ;;  %v1409_v46 = vmul.f32 %v3127_v30, %v1407_v36  ;;  %v1599_v33 = vadd.f32 1.0, %v2401_v54  ;;  %v1446_v8 = vmul.f32 %v1445_v21, %v1433_v9 }
 0x437   :  { %v2403_v20 = vpop.eup %2402  ;;  %v3211_v56 = vadd.f32 %v1408_v27, %v3148_v40  ;;  %v3214_v61 = vadd.f32 %v1409_v46, %v3150_v13  ;;  %2406 = vrcp.f32 %v1599_v33  ;;  %v1985_v40 = vmul.f32 -1.442695, %v1580_v57  ;;  %v1438_v15 = vpop.permute.xlu1 %1437 }
 0x438   :  { %2375 = vset.pattern.permute.xlu0 %v2573_v7  ;;  %1618 = vperm.xlu1 %2378, %v2403_v20   ;;  %v2405_v38 = vpop.eup %2404  ;;  %v2575_v13 = vmov 4   ;;  %v1465_v47 = vpop.permute.xlu0 %1464  ;;  %v1439_v12 = vsel %vm1432_vm6, %v1436_v24, %v1438_v15  ;;  %v1440_v14 = vsel %vm1432_vm6, %v1438_v15, %v1436_v24  ;;  %v1532_v27 = vstv %s3236_s2 }
 0x439   :  { %1685 = vperm.xlu0 %2375, %v2399_v17   ;;  %v1598_v63 = vadd.f32 1.0, %v2405_v38  ;;  %v1449_v23 = vmul.f32 %v1448_v2, %v1439_v12  ;;  %v1450_v29 = vmul.f32 %v1448_v2, %v1440_v14  ;;  %v1447_v46 = vmul.f32 %v1445_v21, %v1434_v28 }
 0x43a   :  { %v1535_v57 = vstv %s3241_s14  ;;  %v1423_v2 = vadd.f32 %v1421_v0, %v1418_v39 }
 0x43b   :  { %2408 = vrcp.f32 %v1598_v63  ;;  %v1460_v16 = vpop.permute.xlu1 %1459  ;;  %v1451_v33 = vadd.f32 %v1449_v23, %v1446_v8 }
 0x43c   :  { %2379 = vset.pattern.permute.xlu1 %v2573_v7  ;;  %2410 = vpow2.f32 %v1985_v40  ;;  %v3222_v55 = vpop.permute.xlu0 %1486  ;;  %v1462_v36 = vsel %vm1461_vm8, %v1458_v58, %v1460_v16  ;;  %v1463_v54 = vsel %vm1461_vm8, %v1460_v16, %v1458_v58  ;;  %v1427_v26 = vadd.f32 %v1423_v2, %v3214_v61  ;;  %v1753_v2 = vld [vmem:[#allocation2 + $0x58] sm:$0xff] }
 0x43d   :  { %2376 = vset.pattern.permute.xlu0 %v2574_v62  ;;  %1689 = vperm.xlu1 %2379, %v2403_v20   ;;  %v1475_v40 = vmul.f32 %v1474_v5, %v1462_v36 }
 0x43e   :  { %1773 = vperm.xlu0 %2376, %v2399_v17  }
 0x43f   :  { %v1467_v34 = vpop.permute.xlu1 %1466 }
 0x440   :  { %v1468_v51 = vsel %vm1461_vm8, %v1465_v47, %v1467_v34  ;;  %v1469_v45 = vsel %vm1461_vm8, %v1467_v34, %v1465_v47 }
 0x441   :  { %2380 = vset.pattern.permute.xlu1 %v2574_v62  ;;  %v2407_v4 = vpop.eup %2406  ;;  %v1479_v38 = vmul.f32 %v1477_v6, %v1469_v45 }
 0x442   :  { %2377 = vset.pattern.permute.xlu0 %v2575_v13  ;;  %1777 = vperm.xlu1 %2380, %v2403_v20  }
 0x443   :  { %1842 = vperm.xlu0 %2377, %v2399_v17   ;;  %v3220_v44 = vpop.permute.xlu1 %1488 }
 0x444   :  { %v1491_v58 = vsel %vm1490_vm9, %v3222_v55, %v3220_v44 }
 0x445   :  { %v2409_v50 = vpop.eup %2408  ;;  %v1504_v14 = vmul.f32 %v1503_v49, %v1491_v58 }
 0x446   :  { %2381 = vset.pattern.permute.xlu1 %v2575_v13  ;;  %v2411_v41 = vpop.eup %2410 }
 0x447   :  { %2386 = vset.pattern.permute.xlu0 %v2569_v10  ;;  %1846 = vperm.xlu1 %2381, %v2403_v20   ;;  %v1600_v42 = vadd.f32 1.0, %v2411_v41  ;;  %v1496_v43 = vpop.permute.xlu1 %1495  ;;  %v1478_v20 = vmul.f32 %v1477_v6, %v1468_v51 }
 0x448   :  { %1628 = vperm.xlu0 %2386, %v2407_v4  }
 0x449   :  { %2412 = vrcp.f32 %v1600_v42  ;;  %v1480_v15 = vadd.f32 %v1478_v20, %v1475_v40  ;;  %v2423_v20 = vld [vmem:[#allocation2 + $0x8] sm:$0xff] }
 0x44b   :  { %2382 = vset.pattern.permute.xlu1 %v2569_v10  ;;  %v1518_v52 = vpop.permute.xlu1 %1517 }
 0x44c   :  { %2387 = vset.pattern.permute.xlu0 %v2573_v7  ;;  %1623 = vperm.xlu1 %2382, %v2409_v50  }
 0x44d   :  { %1697 = vperm.xlu0 %2387, %v2407_v4  }
 0x44f   :  { %v1525_v60 = vpop.permute.xlu1 %1524 }
 0x450   :  { %2383 = vset.pattern.permute.xlu1 %v2573_v7 }
 0x451   :  { %2388 = vset.pattern.permute.xlu0 %v2574_v62  ;;  %1693 = vperm.xlu1 %2383, %v2409_v50  }
 0x452   :  { %1785 = vperm.xlu0 %2388, %v2407_v4  }
 0x453   :  { %v2413_v53 = vpop.eup %2412 }
 0x455   :  { %2384 = vset.pattern.permute.xlu1 %v2574_v62 }
 0x456   :  { %2392 = vset.pattern.permute.xlu0 %v2575_v13  ;;  %1781 = vperm.xlu1 %2384, %v2409_v50  }
 0x457   :  { %1854 = vperm.xlu0 %2392, %v2407_v4  }
 0x45a   :  { %2385 = vset.pattern.permute.xlu1 %v2575_v13 }
 0x45b   :  { %1850 = vperm.xlu1 %2385, %v2409_v50   ;;  %v1476_v50 = vmul.f32 %v1474_v5, %v1463_v54 }
 0x45f   :  { %2389 = vset.pattern.permute.xlu1 %v2569_v10  ;;  %v1494_v10 = vpop.permute.xlu0 %1493 }
 0x460   :  { %1633 = vperm.xlu1 %2389, %v2413_v53   ;;  %v1497_v41 = vsel %vm1490_vm9, %v1494_v10, %v1496_v43 }
 0x461   :  { %v1507_v48 = vmul.f32 %v1506_v1, %v1497_v41  ;;  %v2425_v41 = vld [vmem:[#allocation2 + $0x18] sm:$0xff] }
 0x463   :  { %v1516_v59 = vpop.permute.xlu0 %1515  ;;  %v1509_v5 = vadd.f32 %v1507_v48, %v1504_v14  ;;  %v2428_v14 = vld [vmem:[#allocation6 + $0x10] sm:$0xff] }
 0x464   :  { %2390 = vset.pattern.permute.xlu1 %v2573_v7  ;;  %v1498_v7 = vsel %vm1490_vm9, %v1496_v43, %v1494_v10  ;;  %v1520_v31 = vsel %vm1519_vm10, %v1516_v59, %v1518_v52  ;;  %v1521_v24 = vsel %vm1519_vm10, %v1518_v52, %v1516_v59  ;;  %v1422_v43 = vadd.f32 %v1420_v32, %v1417_v19 }
 0x465   :  { %1701 = vperm.xlu1 %2390, %v2413_v53   ;;  %v1508_v42 = vmul.f32 %v1506_v1, %v1498_v7  ;;  %v1453_v10 = vmul.f32 %v3135_v25, %v1451_v33  ;;  %v1533_v35 = vmul.f32 %v1532_v27, %v1520_v31  ;;  %v1534_v21 = vmul.f32 %v1532_v27, %v1521_v24  ;;  %v2427_v24 = vld [vmem:[#allocation6 + $0x8] sm:$0xff] }
 0x466   :  { %v1426_v52 = vadd.f32 %v1422_v43, %v3211_v56  ;;  %v1482_v59 = vmul.f32 %v3122_v18, %v1480_v15 }
 0x467   :  { %v1523_v17 = vpop.permute.xlu0 %1522 }
 0x468   :  { %v1526_v63 = vsel %vm1519_vm10, %v1523_v17, %v1525_v60  ;;  %v1527_v4 = vsel %vm1519_vm10, %v1525_v60, %v1523_v17  ;;  %v1455_v19 = vadd.f32 %v1453_v10, %v1426_v52 }
 0x469   :  { %2391 = vset.pattern.permute.xlu1 %v2574_v62  ;;  %v1452_v62 = vadd.f32 %v1450_v29, %v1447_v46  ;;  %v1536_v16 = vmul.f32 %v1535_v57, %v1526_v63  ;;  %v1537_v47 = vmul.f32 %v1535_v57, %v1527_v4  ;;  %v2422_v46 = vld [vmem:[#allocation2] sm:$0xff]  ;;  %v2424_v4 = vld [vmem:[#allocation2 + $0x10] sm:$0xff] }
 0x46a   :  { %1789 = vperm.xlu1 %2391, %v2413_v53   ;;  %v1484_v39 = vadd.f32 %v1482_v59, %v1455_v19 }
 0x46b   :  { %v1454_v30 = vmul.f32 %v3145_v22, %v1452_v62  ;;  %v1538_v9 = vadd.f32 %v1536_v16, %v1533_v35  ;;  %v1539_v32 = vadd.f32 %v1537_v47, %v1534_v21  ;;  %v1752_v35 = vld [vmem:[#allocation2 + $0x50] sm:$0xff] }
 0x46c   :  { %v1513_v56 = vadd.f32 %v1509_v5, %v1484_v39 }
 0x46d   :  { %v1456_v6 = vadd.f32 %v1454_v30, %v1427_v26  ;;  %v1540_v28 = vmul.f32 %v3135_v25, %v1538_v9  ;;  %v2429_v26 = vld [vmem:[#allocation6 + $0x18] sm:$0xff] }
 0x46e   :  { %2393 = vset.pattern.permute.xlu1 %v2575_v13  ;;  %v1492_v13 = vsel %vm1490_vm9, %v3220_v44, %v3222_v55  ;;  %v1529_v55 = vmul.f32 %v3145_v22, %v1948_v37 }
 0x46f   :  { %1858 = vperm.xlu1 %2393, %v2413_v53   ;;  %v1481_v53 = vadd.f32 %v1479_v38, %v1476_v50  ;;  %v1505_v34 = vmul.f32 %v1503_v49, %v1492_v13  ;;  %v1542_v18 = vadd.f32 %v1540_v28, %v1513_v56  ;;  %v1754_v28 = vld [vmem:[#allocation2 + $0x60] sm:$0xff] }
 0x470   :  { %v1541_v51 = vmul.f32 %v1539_v32, %v1529_v55 }
 0x471   :  { %v1510_v12 = vadd.f32 %v1508_v42, %v1505_v34  ;;  %v1483_v44 = vmul.f32 %v1481_v53, %v1471_v11  ;;  %v1979_v49 = vmul.f32 -1.442695, %v1542_v18  ;;  %v2426_v11 = vld [vmem:[#allocation6] sm:$0xff]  ;;  %v1762_v18 = vld [vmem:[#allocation6 + $0x50] sm:$0xff] }
 0x473   :  { %v1512_v0 = vmul.f32 %v1948_v37, %v1510_v12  ;;  %v1485_v23 = vadd.f32 %v1483_v44, %v1456_v6  ;;  %2414 = vpow2.f32 %v1979_v49  ;;  %v3303_v37 = vshrl.u32 %v71_v3, 7 }
 0x475   :  { %v1514_v29 = vadd.f32 %v1512_v0, %v1485_v23  ;;  %v1648_v8 = vsub.s32 1, %v3303_v37  ;;  %v1716_v3 = vsub.s32 0, %v3303_v37  ;;  %v1804_v43 = vsub.s32 3, %v3303_v37  ;;  %v1755_v23 = vld [vmem:[#allocation2 + $0x68] sm:$0xff] }
 0x477   :  { %v1543_v45 = vadd.f32 %v1541_v51, %v1514_v29  ;;  %v1873_v51 = vsub.s32 2, %v3303_v37 }
 0x479   :  { %v1980_v1 = vmul.f32 -1.442695, %v1543_v45  ;;  %v1763_v45 = vld [vmem:[#allocation6 + $0x58] sm:$0xff] }
 0x47b   :  { %2416 = vpow2.f32 %v1980_v1 }
 0x47d   :  { %v2415_v61 = vpop.eup %2414 }
 0x47e   :  { %v1550_v17 = vadd.f32 1.0, %v2415_v61 }
 0x480   :  { %2418 = vrcp.f32 %v1550_v17 }
 0x485   :  { %v2417_v22 = vpop.eup %2416 }
 0x486   :  { %v1551_v60 = vadd.f32 1.0, %v2417_v22 }
 0x488   :  { %2420 = vrcp.f32 %v1551_v60 }
 0x48a   :  { %v3305_v25 = vpop.eup %2418 }
 0x48b   :  { %v3311_v33 = vrot.slane %v3305_v25, %v1648_v8  ;;  %v3320_v53 = vrot.slane %v3305_v25, %v1716_v3  ;;  %v3331_v5 = vrot.slane %v3305_v25, %v1804_v43  ;;  %v3342_v37 = vrot.slane %v3305_v25, %v1873_v51 }
 0x492   :  { %v3308_v36 = vpop.eup %2420 }
 0x493   :  { %v3314_v38 = vrot.slane %v3308_v36, %v1648_v8  ;;  %v3323_v58 = vrot.slane %v3308_v36, %v1716_v3  ;;  %v3334_v6 = vrot.slane %v3308_v36, %v1804_v43 }
 0x4b3   :  { %v1614_v27 = vpop.permute.xlu0 %1613 }
 0x4b4   :  { %v1636_v54 = vmul.f32 %v2422_v46, %v1614_v27  ;;  %v1637_v7 = vmul.f32 %v2423_v20, %v1614_v27 }
 0x4b6   :  { %v1654_v57 = vmul.f32 %v3311_v33, %v1636_v54  ;;  %v1655_v63 = vmul.f32 %v3314_v38, %v1637_v7 }
 0x4b7   :  { %v1619_v62 = vpop.permute.xlu1 %1618 }
 0x4b8   :  { %v1664_v40 = vadd.f32 %v2422_v46, %v1654_v57  ;;  %v1665_v13 = vadd.f32 %v2423_v20, %v1655_v63  ;;  %v1638_v50 = vmul.f32 %v2424_v4, %v1619_v62  ;;  %v1639_v42 = vmul.f32 %v2425_v41, %v1619_v62  ;;  %v1686_v31 = vpop.permute.xlu0 %1685  ;;  %v1764_v57 = vld [vmem:[#allocation6 + $0x60] sm:$0xff]  ;;  %v1765_v63 = vld [vmem:[#allocation6 + $0x68] sm:$0xff] }
 0x4b9   :  { %v1704_v15 = vmul.f32 %v2426_v11, %v1686_v31  ;;  %v1705_v16 = vmul.f32 %v2427_v24, %v1686_v31  ;;  %v3345_v20 = vrot.slane %v3308_v36, %v1873_v51  ;;  %v1759_v51 = vld [vmem:[#allocation2 + $0x88] sm:$0xff] }
 0x4ba   :  { %1674 = vst [vmem:[#allocation9] sm:$0xff] %v1664_v40  ;;  %1675 = vst [vmem:[#allocation9 + $0x8] sm:$0xff] %v1665_v13  ;;  %v1656_v34 = vmul.f32 %v3311_v33, %v1638_v50  ;;  %v1657_v47 = vmul.f32 %v3314_v38, %v1639_v42 }
 0x4bb   :  { %v1722_v10 = vmul.f32 %v3320_v53, %v1704_v15  ;;  %v1723_v48 = vmul.f32 %v3323_v58, %v1705_v16 }
 0x4bc   :  { %v1666_v30 = vadd.f32 %v2424_v4, %v1656_v34  ;;  %v1667_v12 = vadd.f32 %v2425_v41, %v1657_v47  ;;  %v1690_v21 = vpop.permute.xlu1 %1689 }
 0x4bd   :  { %v1732_v52 = vadd.f32 %v2426_v11, %v1722_v10  ;;  %v1733_v59 = vadd.f32 %v2427_v24, %v1723_v48  ;;  %v1706_v9 = vmul.f32 %v2428_v14, %v1690_v21  ;;  %v1707_v44 = vmul.f32 %v2429_v26, %v1690_v21  ;;  %v1774_v55 = vpop.permute.xlu0 %1773  ;;  %v2430_v11 = vld [vmem:[#allocation2 + $0x30] sm:$0xff]  ;;  %v2431_v24 = vld [vmem:[#allocation2 + $0x38] sm:$0xff]  ;;  %v2432_v21 = vld [vmem:[#allocation2 + $0x20] sm:$0xff] }
 0x4be   :  { %1676 = vst [vmem:[#allocation9 + $0x10] sm:$0xff] %v1666_v30  ;;  %1677 = vst [vmem:[#allocation9 + $0x18] sm:$0xff] %v1667_v12  ;;  %v1792_v32 = vmul.f32 %v1774_v55, %v1752_v35  ;;  %v1793_v19 = vmul.f32 %v1774_v55, %v1753_v2  ;;  %v2435_v55 = vld [vmem:[#allocation6 + $0x38] sm:$0xff] }
 0x4bf   :  { %1742 = vst [vmem:[#allocation10] sm:$0xff] %v1732_v52  ;;  %1743 = vst [vmem:[#allocation10 + $0x8] sm:$0xff] %v1733_v59  ;;  %v1724_v0 = vmul.f32 %v3320_v53, %v1706_v9  ;;  %v1725_v39 = vmul.f32 %v3323_v58, %v1707_v44  ;;  %v2433_v59 = vld [vmem:[#allocation2 + $0x28] sm:$0xff] }
 0x4c0   :  { %v1810_v56 = vmul.f32 %v3331_v5, %v1792_v32  ;;  %v1811_v29 = vmul.f32 %v3334_v6, %v1793_v19 }
 0x4c1   :  { %v1734_v49 = vadd.f32 %v2428_v14, %v1724_v0  ;;  %v1735_v1 = vadd.f32 %v2429_v26, %v1725_v39  ;;  %v1778_v61 = vpop.permute.xlu1 %1777  ;;  %v2434_v26 = vld [vmem:[#allocation6 + $0x30] sm:$0xff] }
 0x4c2   :  { %v1820_v22 = vadd.f32 %v1810_v56, %v1752_v35  ;;  %v1821_v17 = vadd.f32 %v1811_v29, %v1753_v2  ;;  %v1794_v60 = vmul.f32 %v1778_v61, %v1754_v28  ;;  %v1795_v8 = vmul.f32 %v1778_v61, %v1755_v23  ;;  %v1843_v27 = vpop.permute.xlu0 %1842 }
 0x4c3   :  { %1744 = vst [vmem:[#allocation10 + $0x10] sm:$0xff] %v1734_v49  ;;  %1745 = vst [vmem:[#allocation10 + $0x18] sm:$0xff] %v1735_v1  ;;  %v1861_v46 = vmul.f32 %v1843_v27, %v1762_v18  ;;  %v1862_v54 = vmul.f32 %v1843_v27, %v1763_v45  ;;  %v2436_v1 = vld [vmem:[#allocation6 + $0x20] sm:$0xff] }
 0x4c4   :  { %1831 = vst [vmem:[#allocation9 + $0x50] sm:$0xff] %v1820_v22  ;;  %1832 = vst [vmem:[#allocation9 + $0x58] sm:$0xff] %v1821_v17  ;;  %v1812_v7 = vmul.f32 %v3331_v5, %v1794_v60  ;;  %v1813_v3 = vmul.f32 %v3334_v6, %v1795_v8  ;;  %v2437_v22 = vld [vmem:[#allocation6 + $0x28] sm:$0xff] }
 0x4c5   :  { %v1879_v62 = vmul.f32 %v3342_v37, %v1861_v46  ;;  %v1880_v40 = vmul.f32 %v3345_v20, %v1862_v54 }
 0x4c6   :  { %v1822_v13 = vadd.f32 %v1812_v7, %v1754_v28  ;;  %v1823_v4 = vadd.f32 %v1813_v3, %v1755_v23  ;;  %v1847_v50 = vpop.permute.xlu1 %1846  ;;  %v1758_v23 = vld [vmem:[#allocation2 + $0x80] sm:$0xff]  ;;  %v1756_v7 = vld [vmem:[#allocation2 + $0x70] sm:$0xff]  ;;  %v1757_v3 = vld [vmem:[#allocation2 + $0x78] sm:$0xff] }
 0x4c7   :  { %v1889_v25 = vadd.f32 %v1879_v62, %v1762_v18  ;;  %v1890_v41 = vadd.f32 %v1880_v40, %v1763_v45  ;;  %v1863_v42 = vmul.f32 %v1847_v50, %v1764_v57  ;;  %v1864_v36 = vmul.f32 %v1847_v50, %v1765_v63  ;;  %v1629_v31 = vpop.permute.xlu0 %1628  ;;  %v1768_v62 = vld [vmem:[#allocation6 + $0x80] sm:$0xff]  ;;  %v1769_v40 = vld [vmem:[#allocation6 + $0x88] sm:$0xff] }
 0x4c8   :  { %1833 = vst [vmem:[#allocation9 + $0x60] sm:$0xff] %v1822_v13  ;;  %1834 = vst [vmem:[#allocation9 + $0x68] sm:$0xff] %v1823_v4  ;;  %v1642_v15 = vmul.f32 %v2430_v11, %v1629_v31  ;;  %v1643_v16 = vmul.f32 %v2431_v24, %v1629_v31 }
 0x4c9   :  { %1900 = vst [vmem:[#allocation10 + $0x50] sm:$0xff] %v1889_v25  ;;  %1901 = vst [vmem:[#allocation10 + $0x58] sm:$0xff] %v1890_v41  ;;  %v1881_v34 = vmul.f32 %v3342_v37, %v1863_v42  ;;  %v1882_v47 = vmul.f32 %v3345_v20, %v1864_v36 }
 0x4ca   :  { %v1660_v43 = vmul.f32 %v3311_v33, %v1642_v15  ;;  %v1661_v10 = vmul.f32 %v3314_v38, %v1643_v16 }
 0x4cb   :  { %v1891_v48 = vadd.f32 %v1881_v34, %v1764_v57  ;;  %v1892_v35 = vadd.f32 %v1882_v47, %v1765_v63  ;;  %v1624_v2 = vpop.permute.xlu1 %1623  ;;  %v1766_v34 = vld [vmem:[#allocation6 + $0x70] sm:$0xff]  ;;  %v1767_v47 = vld [vmem:[#allocation6 + $0x78] sm:$0xff] }
 0x4cc   :  { %v1670_v30 = vadd.f32 %v2430_v11, %v1660_v43  ;;  %v1671_v12 = vadd.f32 %v2431_v24, %v1661_v10  ;;  %v1640_v52 = vmul.f32 %v2432_v21, %v1624_v2  ;;  %v1641_v14 = vmul.f32 %v2433_v59, %v1624_v2  ;;  %v1698_v9 = vpop.permute.xlu0 %1697 }
 0x4cd   :  { %1902 = vst [vmem:[#allocation10 + $0x60] sm:$0xff] %v1891_v48  ;;  %1903 = vst [vmem:[#allocation10 + $0x68] sm:$0xff] %v1892_v35  ;;  %v1710_v44 = vmul.f32 %v2434_v26, %v1698_v9  ;;  %v1711_v32 = vmul.f32 %v2435_v55, %v1698_v9 }
 0x4ce   :  { %1680 = vst [vmem:[#allocation9 + $0x30] sm:$0xff] %v1670_v30  ;;  %1681 = vst [vmem:[#allocation9 + $0x38] sm:$0xff] %v1671_v12  ;;  %v1658_v19 = vmul.f32 %v3311_v33, %v1640_v52  ;;  %v1659_v0 = vmul.f32 %v3314_v38, %v1641_v14 }
 0x4cf   :  { %v1728_v39 = vmul.f32 %v3320_v53, %v1710_v44  ;;  %v1729_v28 = vmul.f32 %v3323_v58, %v1711_v32 }
 0x4d0   :  { %v1668_v56 = vadd.f32 %v2432_v21, %v1658_v19  ;;  %v1669_v29 = vadd.f32 %v2433_v59, %v1659_v0  ;;  %v1694_v18 = vpop.permute.xlu1 %1693  ;;  %v2439_v19 = vld [vmem:[#allocation2 + $0x48] sm:$0xff] }
 0x4d1   :  { %v1738_v45 = vadd.f32 %v2434_v26, %v1728_v39  ;;  %v1739_v49 = vadd.f32 %v2435_v55, %v1729_v28  ;;  %v1708_v61 = vmul.f32 %v2436_v1, %v1694_v18  ;;  %v1709_v17 = vmul.f32 %v2437_v22, %v1694_v18  ;;  %v1786_v60 = vpop.permute.xlu0 %1785  ;;  %v2438_v55 = vld [vmem:[#allocation2 + $0x40] sm:$0xff] }
 0x4d2   :  { %1678 = vst [vmem:[#allocation9 + $0x20] sm:$0xff] %v1668_v56  ;;  %1679 = vst [vmem:[#allocation9 + $0x28] sm:$0xff] %v1669_v29  ;;  %v1798_v8 = vmul.f32 %v1786_v60, %v1758_v23  ;;  %v1799_v27 = vmul.f32 %v1786_v60, %v1759_v51  ;;  %v2440_v29 = vld [vmem:[#allocation6 + $0x40] sm:$0xff] }
 0x4d3   :  { %1748 = vst [vmem:[#allocation10 + $0x30] sm:$0xff] %v1738_v45  ;;  %1749 = vst [vmem:[#allocation10 + $0x38] sm:$0xff] %v1739_v49  ;;  %v1726_v46 = vmul.f32 %v3320_v53, %v1708_v61  ;;  %v1727_v54 = vmul.f32 %v3323_v58, %v1709_v17  ;;  %v2441_v45 = vld [vmem:[#allocation6 + $0x48] sm:$0xff]  ;;  %v1761_v17 = vld [vmem:[#allocation2 + $0x98] sm:$0xff] }
 0x4d4   :  { %v1816_v57 = vmul.f32 %v3331_v5, %v1798_v8  ;;  %v1817_v63 = vmul.f32 %v3334_v6, %v1799_v27 }
 0x4d5   :  { %v1736_v13 = vadd.f32 %v2436_v1, %v1726_v46  ;;  %v1737_v4 = vadd.f32 %v2437_v22, %v1727_v54  ;;  %v1782_v50 = vpop.permute.xlu1 %1781  ;;  %v1760_v22 = vld [vmem:[#allocation2 + $0x90] sm:$0xff] }
 0x4d6   :  { %v1826_v25 = vadd.f32 %v1816_v57, %v1758_v23  ;;  %v1827_v41 = vadd.f32 %v1817_v63, %v1759_v51  ;;  %v1796_v42 = vmul.f32 %v1782_v50, %v1756_v7  ;;  %v1797_v36 = vmul.f32 %v1782_v50, %v1757_v3  ;;  %v1855_v31 = vpop.permute.xlu0 %1854 }
 0x4d7   :  { %1746 = vst [vmem:[#allocation10 + $0x20] sm:$0xff] %v1736_v13  ;;  %1747 = vst [vmem:[#allocation10 + $0x28] sm:$0xff] %v1737_v4  ;;  %v1867_v11 = vmul.f32 %v1855_v31, %v1768_v62  ;;  %v1868_v15 = vmul.f32 %v1855_v31, %v1769_v40 }
 0x4d8   :  { %1837 = vst [vmem:[#allocation9 + $0x80] sm:$0xff] %v1826_v25  ;;  %1838 = vst [vmem:[#allocation9 + $0x88] sm:$0xff] %v1827_v41  ;;  %v1814_v24 = vmul.f32 %v3331_v5, %v1796_v42  ;;  %v1815_v16 = vmul.f32 %v3334_v6, %v1797_v36 }
 0x4d9   :  { %v1885_v43 = vmul.f32 %v3342_v37, %v1867_v11  ;;  %v1886_v10 = vmul.f32 %v3345_v20, %v1868_v15 }
 0x4da   :  { %v1824_v48 = vadd.f32 %v1814_v24, %v1756_v7  ;;  %v1825_v35 = vadd.f32 %v1815_v16, %v1757_v3  ;;  %v1851_v2 = vpop.permute.xlu1 %1850  ;;  %v1770_v7 = vld [vmem:[#allocation6 + $0x90] sm:$0xff]  ;;  %v1771_v3 = vld [vmem:[#allocation6 + $0x98] sm:$0xff] }
 0x4db   :  { %v1895_v30 = vadd.f32 %v1885_v43, %v1768_v62  ;;  %v1896_v12 = vadd.f32 %v1886_v10, %v1769_v40  ;;  %v1865_v21 = vmul.f32 %v1851_v2, %v1766_v34  ;;  %v1866_v52 = vmul.f32 %v1851_v2, %v1767_v47 }
 0x4dc   :  { %1835 = vst [vmem:[#allocation9 + $0x70] sm:$0xff] %v1824_v48  ;;  %1836 = vst [vmem:[#allocation9 + $0x78] sm:$0xff] %v1825_v35 }
 0x4dd   :  { %1906 = vst [vmem:[#allocation10 + $0x80] sm:$0xff] %v1895_v30  ;;  %1907 = vst [vmem:[#allocation10 + $0x88] sm:$0xff] %v1896_v12  ;;  %v1883_v59 = vmul.f32 %v3342_v37, %v1865_v21  ;;  %v1884_v14 = vmul.f32 %v3345_v20, %v1866_v52 }
 0x4df   :  { %v1893_v9 = vadd.f32 %v1883_v59, %v1766_v34  ;;  %v1894_v26 = vadd.f32 %v1884_v14, %v1767_v47  ;;  %v1634_v44 = vpop.permute.xlu1 %1633 }
 0x4e0   :  { %v1644_v32 = vmul.f32 %v2438_v55, %v1634_v44  ;;  %v1645_v0 = vmul.f32 %v2439_v19, %v1634_v44 }
 0x4e1   :  { %1904 = vst [vmem:[#allocation10 + $0x70] sm:$0xff] %v1893_v9  ;;  %1905 = vst [vmem:[#allocation10 + $0x78] sm:$0xff] %v1894_v26 }
 0x4e2   :  { %v1662_v39 = vmul.f32 %v3311_v33, %v1644_v32  ;;  %v1663_v28 = vmul.f32 %v3314_v38, %v1645_v0 }
 0x4e4   :  { %v1672_v23 = vadd.f32 %v2438_v55, %v1662_v39  ;;  %v1673_v51 = vadd.f32 %v2439_v19, %v1663_v28  ;;  %v1702_v56 = vpop.permute.xlu1 %1701 }
 0x4e5   :  { %v1712_v18 = vmul.f32 %v2440_v29, %v1702_v56  ;;  %v1713_v49 = vmul.f32 %v2441_v45, %v1702_v56 }
 0x4e6   :  { %1682 = vst [vmem:[#allocation9 + $0x40] sm:$0xff] %v1672_v23  ;;  %1683 = vst [vmem:[#allocation9 + $0x48] sm:$0xff] %v1673_v51 }
 0x4e7   :  { %v1730_v1 = vmul.f32 %v3320_v53, %v1712_v18  ;;  %v1731_v61 = vmul.f32 %v3323_v58, %v1713_v49 }
 0x4e9   :  { %v1740_v60 = vadd.f32 %v2440_v29, %v1730_v1  ;;  %v1741_v8 = vadd.f32 %v2441_v45, %v1731_v61  ;;  %v1790_v33 = vpop.permute.xlu1 %1789 }
 0x4ea   :  { %v1800_v27 = vmul.f32 %v1790_v33, %v1760_v22  ;;  %v1801_v38 = vmul.f32 %v1790_v33, %v1761_v17 }
 0x4eb   :  { %1750 = vst [vmem:[#allocation10 + $0x40] sm:$0xff] %v1740_v60  ;;  %1751 = vst [vmem:[#allocation10 + $0x48] sm:$0xff] %v1741_v8 }
 0x4ec   :  { %v1818_v46 = vmul.f32 %v3331_v5, %v1800_v27  ;;  %v1819_v54 = vmul.f32 %v3334_v6, %v1801_v38 }
 0x4ee   :  { %v1828_v53 = vadd.f32 %v1818_v46, %v1760_v22  ;;  %v1829_v57 = vadd.f32 %v1819_v54, %v1761_v17  ;;  %v1859_v58 = vpop.permute.xlu1 %1858 }
 0x4ef   :  { %v1869_v63 = vmul.f32 %v1859_v58, %v1770_v7  ;;  %v1870_v62 = vmul.f32 %v1859_v58, %v1771_v3 }
 0x4f0   :  { %1839 = vst [vmem:[#allocation9 + $0x90] sm:$0xff] %v1828_v53  ;;  %1840 = vst [vmem:[#allocation9 + $0x98] sm:$0xff] %v1829_v57 }
 0x4f1   :  { %v1887_v40 = vmul.f32 %v3342_v37, %v1869_v63  ;;  %v1888_v13 = vmul.f32 %v3345_v20, %v1870_v62 }
 0x4f2   :  { %2509 = shalt.err (!%p2506_p11)
}
 0x4f3   :  { %s2510_s23 = scalar_lea.hbm %s3412_s5, 2560 }
 0x4f4   :  { %p2511_p12 = scmp.ne.s32.totalorder %s3412_s5, %s2510_s23  ;;  %p2514_p13 = scmp.lt.u32.totalorder %s2510_s23, %s3412_s5 }
 0x4f6   :  { %p2516_p0 = pnand %p2514_p13, %p2511_p12 }
 0x4f8   :  { %2519 = shalt.err (!%p2516_p0)
}
 0x4f9   :  { %1921 = dma.vmem_to_hbm [thread:$0]  %s1916_s16, 2560, %s3412_s5, [#allocation4], %s2553_s7, %s2553_s7, %s2554_s8   ;;  %v1897_v5 = vadd.f32 %v1887_v40, %v1770_v7  ;;  %v1898_v6 = vadd.f32 %v1888_v13, %v1771_v3 }
 0x4fa   :  { %s2520_s1 = scalar_lea.vmem %s1928_s18, 2560  ;;  %p2525_p2 = scmp.lt.s32.totalorder %s1928_s18, %s1928_s18 }
 0x4fb   :  { %1908 = vst [vmem:[#allocation10 + $0x90] sm:$0xff] %v1897_v5  ;;  %1909 = vst [vmem:[#allocation10 + $0x98] sm:$0xff] %v1898_v6  ;;  %p2521_p1 = scmp.ne.s32.totalorder %s1928_s18, %s2520_s1  ;;  %p2526_p3 = scmp.lt.s32.totalorder %s2520_s1, %s2520_s1 }
 0x4fd   :  { %p2527_p4 = por %p2526_p3, %p2525_p2 }
 0x4ff   :  { %p2528_p5 = pnand %p2527_p4, %p2521_p1 }
 0x501   :  { %2531 = shalt.err (!%p2528_p5)
}
 0x502   :  { %s2532_s28 = scalar_lea.hbm %s3413_s6, 2560 }
 0x503   :  { %p2533_p6 = scmp.ne.s32.totalorder %s3413_s6, %s2532_s28  ;;  %p2536_p7 = scmp.lt.u32.totalorder %s2532_s28, %s3413_s6 }
 0x505   :  { %p2538_p8 = pnand %p2536_p7, %p2533_p6 }
 0x507   :  { %2541 = shalt.err (!%p2538_p8)
}
 0x508   :  { %1933 = dma.vmem_to_hbm [thread:$0]  %s1928_s18, 2560, %s3413_s6, [#allocation11], %s2553_s7, %s2553_s7, %s2554_s8  }
 0x509   :  { %2548 = dma.done.wait [#allocation4], 2560  }
 0x50a   :  { %2549 = vsyncadd [#allocation4], 4294964736 }
 0x50b   :  { %2550 = dma.done.wait [#allocation11], 2560  }
 0x50c   :  { %2551 = vsyncadd [#allocation11], 4294964736 }
 0x50d   :  { %1940 = vsyncpa [#allocation3], 1 }
 0x50e   :  { %1941 = vsyncpa [#allocation7], 1 }
 0x50f   :  { %1942 = vsyncpa [#allocation4], 1 }
 0x510   :  { %1943 = vsyncpa [#allocation11], 1 }
 0x511   :  { %1944 = vsyncpa [#allocation5], 1 }

</bundles_post_ra>
